<compile_context>
chip_gen: v7x
topology: tpu7x:2x2x1
jax: 0.10.0
libtpu: 0.0.40
codegen_flags: <defaults>
</compile_context>

<pallas_src>
import functools

import jax
import jax.numpy as jnp
from jax.experimental import pallas as pl
from jax.experimental.pallas import tpu as pltpu


def _lstm_encoder_kernel(xg_ref, whh_ref, w1_ref, b1_ref, w2_ref, b2_ref, out_ref,
                         *, hidden_size, seq_len, unroll):
    """xg_ref: (T, Bp, 4H) precomputed input gates (x@W_ih^T + b_ih + b_hh), time-major.
    whh_ref: (H, 4H) = W_hh^T.  w1/b1/w2/b2: fc head (w2/b2 lane-padded to Cp >= 128).
    out_ref: (Bp, Cp) logits."""
    H = hidden_size
    T = seq_len

    def activations(gates):
        # PyTorch gate order: i, f, g, o
        i_g = jax.nn.sigmoid(gates[:, 0 * H:1 * H])
        f_g = jax.nn.sigmoid(gates[:, 1 * H:2 * H])
        g_g = jnp.tanh(gates[:, 2 * H:3 * H])
        o_g = jax.nn.sigmoid(gates[:, 3 * H:4 * H])
        return i_g, f_g, g_g, o_g

    # --- t = 0 specialized: h0 = c0 = 0, so gates = xg[0], c = i*g (no matmul, no f*c). ---
    i_g, _, g_g, o_g = activations(xg_ref[0])
    c = i_g * g_g
    h = o_g * jnp.tanh(c)

    # --- t = 1 .. T-1: one MXU matmul per step; xg slab read by leading-axis index. ---
    def step(t, carry):
        h, c = carry
        gates = xg_ref[t] + jnp.dot(h, whh_ref[...], preferred_element_type=jnp.float32)
        i_g, f_g, g_g, o_g = activations(gates)
        c = f_g * c + i_g * g_g
        h = o_g * jnp.tanh(c)
        return (h, c)

    h, _ = jax.lax.fori_loop(1, T, step, (h, c), unroll=unroll)

    # --- fc head on h_n[-1]: Linear(H,128) -> ReLU -> Linear(128, Cp) (Cp lane-dense). ---
    z = jnp.dot(h, w1_ref[...], preferred_element_type=jnp.float32) + b1_ref[...]
    z = jnp.maximum(z, 0.0)
    logits = jnp.dot(z, w2_ref[...], preferred_element_type=jnp.float32) + b2_ref[...]
    out_ref[...] = logits.astype(out_ref.dtype)


def lstm_encoder_forward(x, params):
    """x: (B, T, D) float32 (batch_first, like nn.LSTM(batch_first=True)).
    Returns logits (B, num_classes)."""
    B, T, D = x.shape
    H = params["whh"].shape[0]
    C = params["w2"].shape[1]

    Bp = max(8, ((B + 7) // 8) * 8)            # pad batch to f32 sublane minimum
    Cp = max(128, ((C + 127) // 128) * 128)    # lane-dense output width

    x_p = x if Bp == B else jnp.pad(x, ((0, Bp - B), (0, 0), (0, 0)))

    # Hoist the input projection for all timesteps off the sequential critical path:
    # one (T*Bp, D)@(D, 4H) matmul emitted time-major so each step reads a leading-axis slab.
    xg = jnp.einsum("btd,dg->tbg", x_p, params["wih"],
                    preferred_element_type=jnp.float32) + params["b"]

    # Zero-pad the final linear to a lane-dense width (padded logits sliced off below).
    w2p = jnp.pad(params["w2"], ((0, 0), (0, Cp - C)))
    b2p = jnp.pad(params["b2"], ((0, 0), (0, Cp - C)))

    kernel = functools.partial(
        _lstm_encoder_kernel,
        hidden_size=H,
        seq_len=T,
        unroll=True if T <= 16 else 8,   # fully unroll short sequences for LLO visibility
    )

    out = pl.pallas_call(
        kernel,
        out_shape=jax.ShapeDtypeStruct((Bp, Cp), jnp.float32),
        in_specs=[pl.BlockSpec(memory_space=pltpu.MemorySpace.VMEM) for _ in range(6)],
        out_specs=pl.BlockSpec(memory_space=pltpu.MemorySpace.VMEM),
        compiler_params=pltpu.CompilerParams(vmem_limit_bytes=64 << 20),
    )(xg, params["whh"], params["w1"], params["b1"], w2p, b2p)

    return out[:B, :C]


def init_params(key, input_size, hidden_size=128, num_classes=6):
    """Deterministic init mimicking PyTorch shapes (weights stored pre-transposed)."""
    H = hidden_size
    ks = jax.random.split(key, 8)
    s_lstm = 1.0 / jnp.sqrt(H)
    s_fc1 = 1.0 / jnp.sqrt(H)
    s_fc2 = 1.0 / jnp.sqrt(128)

    def u(k, shape, s):
        return jax.random.uniform(k, shape, jnp.float32, -s, s)

    params = {
        # nn.LSTM: weight_ih (4H, D), weight_hh (4H, H), bias_ih (4H), bias_hh (4H)
        "wih": u(ks[0], (input_size, 4 * H), s_lstm),      # = weight_ih.T
        "whh": u(ks[1], (H, 4 * H), s_lstm),               # = weight_hh.T
        "b": (u(ks[2], (1, 4 * H), s_lstm) + u(ks[3], (1, 4 * H), s_lstm)),  # bias_ih + bias_hh
        # fc: Linear(H,128) -> ReLU -> Linear(128,C)
        "w1": u(ks[4], (H, 128), s_fc1),
        "b1": u(ks[5], (1, 128), s_fc1),
        "w2": u(ks[6], (128, num_classes), s_fc2),
        "b2": u(ks[7], (1, num_classes), s_fc2),
    }
    return params


def lstm_encoder_reference(x, params):
    """Pure-JAX reference (lax.scan) with identical semantics, for validation."""
    B, T, D = x.shape
    H = params["whh"].shape[0]

    def step(carry, x_t):
        h, c = carry
        gates = x_t @ params["wih"] + h @ params["whh"] + params["b"]
        i_g = jax.nn.sigmoid(gates[:, 0 * H:1 * H])
        f_g = jax.nn.sigmoid(gates[:, 1 * H:2 * H])
        g_g = jnp.tanh(gates[:, 2 * H:3 * H])
        o_g = jax.nn.sigmoid(gates[:, 3 * H:4 * H])
        c = f_g * c + i_g * g_g
        h = o_g * jnp.tanh(c)
        return (h, c), None

    h0 = jnp.zeros((B, H), jnp.float32)
    c0 = jnp.zeros((B, H), jnp.float32)
    (h, _), _ = jax.lax.scan(step, (h0, c0), jnp.transpose(x, (1, 0, 2)))
    z = jnp.maximum(h @ params["w1"] + params["b1"], 0.0)
    return z @ params["w2"] + params["b2"]


if __name__ == "__main__":
    B, T, D = 4, 8, 9          # batch, seq_len, input_size (HAR-like 9 sensor channels)
    H, C = 128, 6              # hidden_size (module default), num_classes

    key = jax.random.PRNGKey(0)
    k_x, k_p = jax.random.split(key)
    x = jax.random.normal(k_x, (B, T, D), jnp.float32)
    params = init_params(k_p, D, H, C)

    out = jax.block_until_ready(lstm_encoder_forward(x, params))
    ref = jax.block_until_ready(lstm_encoder_reference(x, params))

    assert out.shape == (B, C), out.shape
    assert jnp.allclose(out, ref, atol=1e-4, rtol=1e-4), float(jnp.max(jnp.abs(out - ref)))
    print("KERNEL_OK")
</pallas_src>

<mosaic_0001>
module attributes {stable_mosaic.version = 11 : i64} {
  func.func @_lstm_encoder_kernel(%arg0: memref<8x8x512xf32, #tpu.memory_space<vmem>>, %arg1: memref<128x512xf32, #tpu.memory_space<vmem>>, %arg2: memref<128x128xf32, #tpu.memory_space<vmem>>, %arg3: memref<1x128xf32, #tpu.memory_space<vmem>>, %arg4: memref<128x128xf32, #tpu.memory_space<vmem>>, %arg5: memref<1x128xf32, #tpu.memory_space<vmem>>, %arg6: memref<8x128xf32, #tpu.memory_space<vmem>>) attributes {dimension_semantics = [], scalar_prefetch = 0 : i64, scratch_operands = 0 : i64, tpu.core_type = #tpu.core_type<tc>} {
    %c0 = arith.constant 0 : index
    %c0_0 = arith.constant 0 : index
    %c0_1 = arith.constant 0 : index
    %0 = vector.load %arg0[%c0, %c0_0, %c0_1] : memref<8x8x512xf32, #tpu.memory_space<vmem>>, vector<1x8x512xf32>
    %1 = vector.shape_cast %0 : vector<1x8x512xf32> to vector<8x512xf32>
    %2 = vector.extract_strided_slice %1 {offsets = [0, 0], sizes = [8, 128], strides = [1, 1]} : vector<8x512xf32> to vector<8x128xf32>
    %3 = arith.negf %2 : vector<8x128xf32>
    %4 = math.exp %3 : vector<8x128xf32>
    %cst = arith.constant 1.000000e+00 : f32
    %5 = vector.broadcast %cst : f32 to vector<8x128xf32>
    %6 = arith.addf %5, %4 : vector<8x128xf32>
    %7 = arith.divf %5, %6 : vector<8x128xf32>
    %8 = vector.extract_strided_slice %1 {offsets = [0, 256], sizes = [8, 128], strides = [1, 1]} : vector<8x512xf32> to vector<8x128xf32>
    %9 = math.tanh %8 : vector<8x128xf32>
    %10 = vector.extract_strided_slice %1 {offsets = [0, 384], sizes = [8, 128], strides = [1, 1]} : vector<8x512xf32> to vector<8x128xf32>
    %11 = arith.negf %10 : vector<8x128xf32>
    %12 = math.exp %11 : vector<8x128xf32>
    %cst_2 = arith.constant 1.000000e+00 : f32
    %13 = vector.broadcast %cst_2 : f32 to vector<8x128xf32>
    %14 = arith.addf %13, %12 : vector<8x128xf32>
    %15 = arith.divf %13, %14 : vector<8x128xf32>
    %16 = arith.mulf %7, %9 : vector<8x128xf32>
    %17 = math.tanh %16 : vector<8x128xf32>
    %18 = arith.mulf %15, %17 : vector<8x128xf32>
    %c1_i32 = arith.constant 1 : i32
    %19 = arith.index_cast %c1_i32 : i32 to index
    %c0_3 = arith.constant 0 : index
    %c0_4 = arith.constant 0 : index
    %20 = vector.load %arg0[%19, %c0_3, %c0_4] : memref<8x8x512xf32, #tpu.memory_space<vmem>>, vector<1x8x512xf32>
    %21 = vector.shape_cast %20 : vector<1x8x512xf32> to vector<8x512xf32>
    %c0_5 = arith.constant 0 : index
    %c0_6 = arith.constant 0 : index
    %22 = vector.load %arg1[%c0_5, %c0_6] : memref<128x512xf32, #tpu.memory_space<vmem>>, vector<128x512xf32>
    %cst_7 = arith.constant dense<0.000000e+00> : vector<8x512xf32>
    %23 = tpu.matmul %18, %22, %cst_7 {dimension_numbers = #tpu.dot_dimension_numbers<[1], [0], [0], [1], [0, 0, 1, 1], [], []>} : vector<8x128xf32>, vector<128x512xf32>, vector<8x512xf32> -> vector<8x512xf32>
    %24 = arith.addf %21, %23 : vector<8x512xf32>
    %25 = vector.extract_strided_slice %24 {offsets = [0, 0], sizes = [8, 128], strides = [1, 1]} : vector<8x512xf32> to vector<8x128xf32>
    %26 = arith.negf %25 : vector<8x128xf32>
    %27 = math.exp %26 : vector<8x128xf32>
    %cst_8 = arith.constant 1.000000e+00 : f32
    %28 = vector.broadcast %cst_8 : f32 to vector<8x128xf32>
    %29 = arith.addf %28, %27 : vector<8x128xf32>
    %30 = arith.divf %28, %29 : vector<8x128xf32>
    %31 = vector.extract_strided_slice %24 {offsets = [0, 128], sizes = [8, 128], strides = [1, 1]} : vector<8x512xf32> to vector<8x128xf32>
    %32 = arith.negf %31 : vector<8x128xf32>
    %33 = math.exp %32 : vector<8x128xf32>
    %cst_9 = arith.constant 1.000000e+00 : f32
    %34 = vector.broadcast %cst_9 : f32 to vector<8x128xf32>
    %35 = arith.addf %34, %33 : vector<8x128xf32>
    %36 = arith.divf %34, %35 : vector<8x128xf32>
    %37 = vector.extract_strided_slice %24 {offsets = [0, 256], sizes = [8, 128], strides = [1, 1]} : vector<8x512xf32> to vector<8x128xf32>
    %38 = math.tanh %37 : vector<8x128xf32>
    %39 = vector.extract_strided_slice %24 {offsets = [0, 384], sizes = [8, 128], strides = [1, 1]} : vector<8x512xf32> to vector<8x128xf32>
    %40 = arith.negf %39 : vector<8x128xf32>
    %41 = math.exp %40 : vector<8x128xf32>
    %cst_10 = arith.constant 1.000000e+00 : f32
    %42 = vector.broadcast %cst_10 : f32 to vector<8x128xf32>
    %43 = arith.addf %42, %41 : vector<8x128xf32>
    %44 = arith.divf %42, %43 : vector<8x128xf32>
    %45 = arith.mulf %36, %16 : vector<8x128xf32>
    %46 = arith.mulf %30, %38 : vector<8x128xf32>
    %47 = arith.addf %45, %46 : vector<8x128xf32>
    %48 = math.tanh %47 : vector<8x128xf32>
    %49 = arith.mulf %44, %48 : vector<8x128xf32>
    %c2_i32 = arith.constant 2 : i32
    %50 = arith.index_cast %c2_i32 : i32 to index
    %c0_11 = arith.constant 0 : index
    %c0_12 = arith.constant 0 : index
    %51 = vector.load %arg0[%50, %c0_11, %c0_12] : memref<8x8x512xf32, #tpu.memory_space<vmem>>, vector<1x8x512xf32>
    %52 = vector.shape_cast %51 : vector<1x8x512xf32> to vector<8x512xf32>
    %c0_13 = arith.constant 0 : index
    %c0_14 = arith.constant 0 : index
    %53 = vector.load %arg1[%c0_13, %c0_14] : memref<128x512xf32, #tpu.memory_space<vmem>>, vector<128x512xf32>
    %cst_15 = arith.constant dense<0.000000e+00> : vector<8x512xf32>
    %54 = tpu.matmul %49, %53, %cst_15 {dimension_numbers = #tpu.dot_dimension_numbers<[1], [0], [0], [1], [0, 0, 1, 1], [], []>} : vector<8x128xf32>, vector<128x512xf32>, vector<8x512xf32> -> vector<8x512xf32>
    %55 = arith.addf %52, %54 : vector<8x512xf32>
    %56 = vector.extract_strided_slice %55 {offsets = [0, 0], sizes = [8, 128], strides = [1, 1]} : vector<8x512xf32> to vector<8x128xf32>
    %57 = arith.negf %56 : vector<8x128xf32>
    %58 = math.exp %57 : vector<8x128xf32>
    %cst_16 = arith.constant 1.000000e+00 : f32
    %59 = vector.broadcast %cst_16 : f32 to vector<8x128xf32>
    %60 = arith.addf %59, %58 : vector<8x128xf32>
    %61 = arith.divf %59, %60 : vector<8x128xf32>
    %62 = vector.extract_strided_slice %55 {offsets = [0, 128], sizes = [8, 128], strides = [1, 1]} : vector<8x512xf32> to vector<8x128xf32>
    %63 = arith.negf %62 : vector<8x128xf32>
    %64 = math.exp %63 : vector<8x128xf32>
    %cst_17 = arith.constant 1.000000e+00 : f32
    %65 = vector.broadcast %cst_17 : f32 to vector<8x128xf32>
    %66 = arith.addf %65, %64 : vector<8x128xf32>
    %67 = arith.divf %65, %66 : vector<8x128xf32>
    %68 = vector.extract_strided_slice %55 {offsets = [0, 256], sizes = [8, 128], strides = [1, 1]} : vector<8x512xf32> to vector<8x128xf32>
    %69 = math.tanh %68 : vector<8x128xf32>
    %70 = vector.extract_strided_slice %55 {offsets = [0, 384], sizes = [8, 128], strides = [1, 1]} : vector<8x512xf32> to vector<8x128xf32>
    %71 = arith.negf %70 : vector<8x128xf32>
    %72 = math.exp %71 : vector<8x128xf32>
    %cst_18 = arith.constant 1.000000e+00 : f32
    %73 = vector.broadcast %cst_18 : f32 to vector<8x128xf32>
    %74 = arith.addf %73, %72 : vector<8x128xf32>
    %75 = arith.divf %73, %74 : vector<8x128xf32>
    %76 = arith.mulf %67, %47 : vector<8x128xf32>
    %77 = arith.mulf %61, %69 : vector<8x128xf32>
    %78 = arith.addf %76, %77 : vector<8x128xf32>
    %79 = math.tanh %78 : vector<8x128xf32>
    %80 = arith.mulf %75, %79 : vector<8x128xf32>
    %c3_i32 = arith.constant 3 : i32
    %81 = arith.index_cast %c3_i32 : i32 to index
    %c0_19 = arith.constant 0 : index
    %c0_20 = arith.constant 0 : index
    %82 = vector.load %arg0[%81, %c0_19, %c0_20] : memref<8x8x512xf32, #tpu.memory_space<vmem>>, vector<1x8x512xf32>
    %83 = vector.shape_cast %82 : vector<1x8x512xf32> to vector<8x512xf32>
    %c0_21 = arith.constant 0 : index
    %c0_22 = arith.constant 0 : index
    %84 = vector.load %arg1[%c0_21, %c0_22] : memref<128x512xf32, #tpu.memory_space<vmem>>, vector<128x512xf32>
    %cst_23 = arith.constant dense<0.000000e+00> : vector<8x512xf32>
    %85 = tpu.matmul %80, %84, %cst_23 {dimension_numbers = #tpu.dot_dimension_numbers<[1], [0], [0], [1], [0, 0, 1, 1], [], []>} : vector<8x128xf32>, vector<128x512xf32>, vector<8x512xf32> -> vector<8x512xf32>
    %86 = arith.addf %83, %85 : vector<8x512xf32>
    %87 = vector.extract_strided_slice %86 {offsets = [0, 0], sizes = [8, 128], strides = [1, 1]} : vector<8x512xf32> to vector<8x128xf32>
    %88 = arith.negf %87 : vector<8x128xf32>
    %89 = math.exp %88 : vector<8x128xf32>
    %cst_24 = arith.constant 1.000000e+00 : f32
    %90 = vector.broadcast %cst_24 : f32 to vector<8x128xf32>
    %91 = arith.addf %90, %89 : vector<8x128xf32>
    %92 = arith.divf %90, %91 : vector<8x128xf32>
    %93 = vector.extract_strided_slice %86 {offsets = [0, 128], sizes = [8, 128], strides = [1, 1]} : vector<8x512xf32> to vector<8x128xf32>
    %94 = arith.negf %93 : vector<8x128xf32>
    %95 = math.exp %94 : vector<8x128xf32>
    %cst_25 = arith.constant 1.000000e+00 : f32
    %96 = vector.broadcast %cst_25 : f32 to vector<8x128xf32>
    %97 = arith.addf %96, %95 : vector<8x128xf32>
    %98 = arith.divf %96, %97 : vector<8x128xf32>
    %99 = vector.extract_strided_slice %86 {offsets = [0, 256], sizes = [8, 128], strides = [1, 1]} : vector<8x512xf32> to vector<8x128xf32>
    %100 = math.tanh %99 : vector<8x128xf32>
    %101 = vector.extract_strided_slice %86 {offsets = [0, 384], sizes = [8, 128], strides = [1, 1]} : vector<8x512xf32> to vector<8x128xf32>
    %102 = arith.negf %101 : vector<8x128xf32>
    %103 = math.exp %102 : vector<8x128xf32>
    %cst_26 = arith.constant 1.000000e+00 : f32
    %104 = vector.broadcast %cst_26 : f32 to vector<8x128xf32>
    %105 = arith.addf %104, %103 : vector<8x128xf32>
    %106 = arith.divf %104, %105 : vector<8x128xf32>
    %107 = arith.mulf %98, %78 : vector<8x128xf32>
    %108 = arith.mulf %92, %100 : vector<8x128xf32>
    %109 = arith.addf %107, %108 : vector<8x128xf32>
    %110 = math.tanh %109 : vector<8x128xf32>
    %111 = arith.mulf %106, %110 : vector<8x128xf32>
    %c4_i32 = arith.constant 4 : i32
    %112 = arith.index_cast %c4_i32 : i32 to index
    %c0_27 = arith.constant 0 : index
    %c0_28 = arith.constant 0 : index
    %113 = vector.load %arg0[%112, %c0_27, %c0_28] : memref<8x8x512xf32, #tpu.memory_space<vmem>>, vector<1x8x512xf32>
    %114 = vector.shape_cast %113 : vector<1x8x512xf32> to vector<8x512xf32>
    %c0_29 = arith.constant 0 : index
    %c0_30 = arith.constant 0 : index
    %115 = vector.load %arg1[%c0_29, %c0_30] : memref<128x512xf32, #tpu.memory_space<vmem>>, vector<128x512xf32>
    %cst_31 = arith.constant dense<0.000000e+00> : vector<8x512xf32>
    %116 = tpu.matmul %111, %115, %cst_31 {dimension_numbers = #tpu.dot_dimension_numbers<[1], [0], [0], [1], [0, 0, 1, 1], [], []>} : vector<8x128xf32>, vector<128x512xf32>, vector<8x512xf32> -> vector<8x512xf32>
    %117 = arith.addf %114, %116 : vector<8x512xf32>
    %118 = vector.extract_strided_slice %117 {offsets = [0, 0], sizes = [8, 128], strides = [1, 1]} : vector<8x512xf32> to vector<8x128xf32>
    %119 = arith.negf %118 : vector<8x128xf32>
    %120 = math.exp %119 : vector<8x128xf32>
    %cst_32 = arith.constant 1.000000e+00 : f32
    %121 = vector.broadcast %cst_32 : f32 to vector<8x128xf32>
    %122 = arith.addf %121, %120 : vector<8x128xf32>
    %123 = arith.divf %121, %122 : vector<8x128xf32>
    %124 = vector.extract_strided_slice %117 {offsets = [0, 128], sizes = [8, 128], strides = [1, 1]} : vector<8x512xf32> to vector<8x128xf32>
    %125 = arith.negf %124 : vector<8x128xf32>
    %126 = math.exp %125 : vector<8x128xf32>
    %cst_33 = arith.constant 1.000000e+00 : f32
    %127 = vector.broadcast %cst_33 : f32 to vector<8x128xf32>
    %128 = arith.addf %127, %126 : vector<8x128xf32>
    %129 = arith.divf %127, %128 : vector<8x128xf32>
    %130 = vector.extract_strided_slice %117 {offsets = [0, 256], sizes = [8, 128], strides = [1, 1]} : vector<8x512xf32> to vector<8x128xf32>
    %131 = math.tanh %130 : vector<8x128xf32>
    %132 = vector.extract_strided_slice %117 {offsets = [0, 384], sizes = [8, 128], strides = [1, 1]} : vector<8x512xf32> to vector<8x128xf32>
    %133 = arith.negf %132 : vector<8x128xf32>
    %134 = math.exp %133 : vector<8x128xf32>
    %cst_34 = arith.constant 1.000000e+00 : f32
    %135 = vector.broadcast %cst_34 : f32 to vector<8x128xf32>
    %136 = arith.addf %135, %134 : vector<8x128xf32>
    %137 = arith.divf %135, %136 : vector<8x128xf32>
    %138 = arith.mulf %129, %109 : vector<8x128xf32>
    %139 = arith.mulf %123, %131 : vector<8x128xf32>
    %140 = arith.addf %138, %139 : vector<8x128xf32>
    %141 = math.tanh %140 : vector<8x128xf32>
    %142 = arith.mulf %137, %141 : vector<8x128xf32>
    %c5_i32 = arith.constant 5 : i32
    %143 = arith.index_cast %c5_i32 : i32 to index
    %c0_35 = arith.constant 0 : index
    %c0_36 = arith.constant 0 : index
    %144 = vector.load %arg0[%143, %c0_35, %c0_36] : memref<8x8x512xf32, #tpu.memory_space<vmem>>, vector<1x8x512xf32>
    %145 = vector.shape_cast %144 : vector<1x8x512xf32> to vector<8x512xf32>
    %c0_37 = arith.constant 0 : index
    %c0_38 = arith.constant 0 : index
    %146 = vector.load %arg1[%c0_37, %c0_38] : memref<128x512xf32, #tpu.memory_space<vmem>>, vector<128x512xf32>
    %cst_39 = arith.constant dense<0.000000e+00> : vector<8x512xf32>
    %147 = tpu.matmul %142, %146, %cst_39 {dimension_numbers = #tpu.dot_dimension_numbers<[1], [0], [0], [1], [0, 0, 1, 1], [], []>} : vector<8x128xf32>, vector<128x512xf32>, vector<8x512xf32> -> vector<8x512xf32>
    %148 = arith.addf %145, %147 : vector<8x512xf32>
    %149 = vector.extract_strided_slice %148 {offsets = [0, 0], sizes = [8, 128], strides = [1, 1]} : vector<8x512xf32> to vector<8x128xf32>
    %150 = arith.negf %149 : vector<8x128xf32>
    %151 = math.exp %150 : vector<8x128xf32>
    %cst_40 = arith.constant 1.000000e+00 : f32
    %152 = vector.broadcast %cst_40 : f32 to vector<8x128xf32>
    %153 = arith.addf %152, %151 : vector<8x128xf32>
    %154 = arith.divf %152, %153 : vector<8x128xf32>
    %155 = vector.extract_strided_slice %148 {offsets = [0, 128], sizes = [8, 128], strides = [1, 1]} : vector<8x512xf32> to vector<8x128xf32>
    %156 = arith.negf %155 : vector<8x128xf32>
    %157 = math.exp %156 : vector<8x128xf32>
    %cst_41 = arith.constant 1.000000e+00 : f32
    %158 = vector.broadcast %cst_41 : f32 to vector<8x128xf32>
    %159 = arith.addf %158, %157 : vector<8x128xf32>
    %160 = arith.divf %158, %159 : vector<8x128xf32>
    %161 = vector.extract_strided_slice %148 {offsets = [0, 256], sizes = [8, 128], strides = [1, 1]} : vector<8x512xf32> to vector<8x128xf32>
    %162 = math.tanh %161 : vector<8x128xf32>
    %163 = vector.extract_strided_slice %148 {offsets = [0, 384], sizes = [8, 128], strides = [1, 1]} : vector<8x512xf32> to vector<8x128xf32>
    %164 = arith.negf %163 : vector<8x128xf32>
    %165 = math.exp %164 : vector<8x128xf32>
    %cst_42 = arith.constant 1.000000e+00 : f32
    %166 = vector.broadcast %cst_42 : f32 to vector<8x128xf32>
    %167 = arith.addf %166, %165 : vector<8x128xf32>
    %168 = arith.divf %166, %167 : vector<8x128xf32>
    %169 = arith.mulf %160, %140 : vector<8x128xf32>
    %170 = arith.mulf %154, %162 : vector<8x128xf32>
    %171 = arith.addf %169, %170 : vector<8x128xf32>
    %172 = math.tanh %171 : vector<8x128xf32>
    %173 = arith.mulf %168, %172 : vector<8x128xf32>
    %c6_i32 = arith.constant 6 : i32
    %174 = arith.index_cast %c6_i32 : i32 to index
    %c0_43 = arith.constant 0 : index
    %c0_44 = arith.constant 0 : index
    %175 = vector.load %arg0[%174, %c0_43, %c0_44] : memref<8x8x512xf32, #tpu.memory_space<vmem>>, vector<1x8x512xf32>
    %176 = vector.shape_cast %175 : vector<1x8x512xf32> to vector<8x512xf32>
    %c0_45 = arith.constant 0 : index
    %c0_46 = arith.constant 0 : index
    %177 = vector.load %arg1[%c0_45, %c0_46] : memref<128x512xf32, #tpu.memory_space<vmem>>, vector<128x512xf32>
    %cst_47 = arith.constant dense<0.000000e+00> : vector<8x512xf32>
    %178 = tpu.matmul %173, %177, %cst_47 {dimension_numbers = #tpu.dot_dimension_numbers<[1], [0], [0], [1], [0, 0, 1, 1], [], []>} : vector<8x128xf32>, vector<128x512xf32>, vector<8x512xf32> -> vector<8x512xf32>
    %179 = arith.addf %176, %178 : vector<8x512xf32>
    %180 = vector.extract_strided_slice %179 {offsets = [0, 0], sizes = [8, 128], strides = [1, 1]} : vector<8x512xf32> to vector<8x128xf32>
    %181 = arith.negf %180 : vector<8x128xf32>
    %182 = math.exp %181 : vector<8x128xf32>
    %cst_48 = arith.constant 1.000000e+00 : f32
    %183 = vector.broadcast %cst_48 : f32 to vector<8x128xf32>
    %184 = arith.addf %183, %182 : vector<8x128xf32>
    %185 = arith.divf %183, %184 : vector<8x128xf32>
    %186 = vector.extract_strided_slice %179 {offsets = [0, 128], sizes = [8, 128], strides = [1, 1]} : vector<8x512xf32> to vector<8x128xf32>
    %187 = arith.negf %186 : vector<8x128xf32>
    %188 = math.exp %187 : vector<8x128xf32>
    %cst_49 = arith.constant 1.000000e+00 : f32
    %189 = vector.broadcast %cst_49 : f32 to vector<8x128xf32>
    %190 = arith.addf %189, %188 : vector<8x128xf32>
    %191 = arith.divf %189, %190 : vector<8x128xf32>
    %192 = vector.extract_strided_slice %179 {offsets = [0, 256], sizes = [8, 128], strides = [1, 1]} : vector<8x512xf32> to vector<8x128xf32>
    %193 = math.tanh %192 : vector<8x128xf32>
    %194 = vector.extract_strided_slice %179 {offsets = [0, 384], sizes = [8, 128], strides = [1, 1]} : vector<8x512xf32> to vector<8x128xf32>
    %195 = arith.negf %194 : vector<8x128xf32>
    %196 = math.exp %195 : vector<8x128xf32>
    %cst_50 = arith.constant 1.000000e+00 : f32
    %197 = vector.broadcast %cst_50 : f32 to vector<8x128xf32>
    %198 = arith.addf %197, %196 : vector<8x128xf32>
    %199 = arith.divf %197, %198 : vector<8x128xf32>
    %200 = arith.mulf %191, %171 : vector<8x128xf32>
    %201 = arith.mulf %185, %193 : vector<8x128xf32>
    %202 = arith.addf %200, %201 : vector<8x128xf32>
    %203 = math.tanh %202 : vector<8x128xf32>
    %204 = arith.mulf %199, %203 : vector<8x128xf32>
    %c7_i32 = arith.constant 7 : i32
    %205 = arith.index_cast %c7_i32 : i32 to index
    %c0_51 = arith.constant 0 : index
    %c0_52 = arith.constant 0 : index
    %206 = vector.load %arg0[%205, %c0_51, %c0_52] : memref<8x8x512xf32, #tpu.memory_space<vmem>>, vector<1x8x512xf32>
    %207 = vector.shape_cast %206 : vector<1x8x512xf32> to vector<8x512xf32>
    %c0_53 = arith.constant 0 : index
    %c0_54 = arith.constant 0 : index
    %208 = vector.load %arg1[%c0_53, %c0_54] : memref<128x512xf32, #tpu.memory_space<vmem>>, vector<128x512xf32>
    %cst_55 = arith.constant dense<0.000000e+00> : vector<8x512xf32>
    %209 = tpu.matmul %204, %208, %cst_55 {dimension_numbers = #tpu.dot_dimension_numbers<[1], [0], [0], [1], [0, 0, 1, 1], [], []>} : vector<8x128xf32>, vector<128x512xf32>, vector<8x512xf32> -> vector<8x512xf32>
    %210 = arith.addf %207, %209 : vector<8x512xf32>
    %211 = vector.extract_strided_slice %210 {offsets = [0, 0], sizes = [8, 128], strides = [1, 1]} : vector<8x512xf32> to vector<8x128xf32>
    %212 = arith.negf %211 : vector<8x128xf32>
    %213 = math.exp %212 : vector<8x128xf32>
    %cst_56 = arith.constant 1.000000e+00 : f32
    %214 = vector.broadcast %cst_56 : f32 to vector<8x128xf32>
    %215 = arith.addf %214, %213 : vector<8x128xf32>
    %216 = arith.divf %214, %215 : vector<8x128xf32>
    %217 = vector.extract_strided_slice %210 {offsets = [0, 128], sizes = [8, 128], strides = [1, 1]} : vector<8x512xf32> to vector<8x128xf32>
    %218 = arith.negf %217 : vector<8x128xf32>
    %219 = math.exp %218 : vector<8x128xf32>
    %cst_57 = arith.constant 1.000000e+00 : f32
    %220 = vector.broadcast %cst_57 : f32 to vector<8x128xf32>
    %221 = arith.addf %220, %219 : vector<8x128xf32>
    %222 = arith.divf %220, %221 : vector<8x128xf32>
    %223 = vector.extract_strided_slice %210 {offsets = [0, 256], sizes = [8, 128], strides = [1, 1]} : vector<8x512xf32> to vector<8x128xf32>
    %224 = math.tanh %223 : vector<8x128xf32>
    %225 = vector.extract_strided_slice %210 {offsets = [0, 384], sizes = [8, 128], strides = [1, 1]} : vector<8x512xf32> to vector<8x128xf32>
    %226 = arith.negf %225 : vector<8x128xf32>
    %227 = math.exp %226 : vector<8x128xf32>
    %cst_58 = arith.constant 1.000000e+00 : f32
    %228 = vector.broadcast %cst_58 : f32 to vector<8x128xf32>
    %229 = arith.addf %228, %227 : vector<8x128xf32>
    %230 = arith.divf %228, %229 : vector<8x128xf32>
    %231 = arith.mulf %222, %202 : vector<8x128xf32>
    %232 = arith.mulf %216, %224 : vector<8x128xf32>
    %233 = arith.addf %231, %232 : vector<8x128xf32>
    %234 = math.tanh %233 : vector<8x128xf32>
    %235 = arith.mulf %230, %234 : vector<8x128xf32>
    %c7_i32_59 = arith.constant 7 : i32
    %c0_60 = arith.constant 0 : index
    %c0_61 = arith.constant 0 : index
    %236 = vector.load %arg2[%c0_60, %c0_61] : memref<128x128xf32, #tpu.memory_space<vmem>>, vector<128x128xf32>
    %cst_62 = arith.constant dense<0.000000e+00> : vector<8x128xf32>
    %237 = tpu.matmul %235, %236, %cst_62 {dimension_numbers = #tpu.dot_dimension_numbers<[1], [0], [0], [1], [0, 0, 1, 1], [], []>} : vector<8x128xf32>, vector<128x128xf32>, vector<8x128xf32> -> vector<8x128xf32>
    %c0_63 = arith.constant 0 : index
    %c0_64 = arith.constant 0 : index
    %238 = vector.load %arg3[%c0_63, %c0_64] : memref<1x128xf32, #tpu.memory_space<vmem>>, vector<1x128xf32>
    %239 = vector.broadcast %238 : vector<1x128xf32> to vector<8x128xf32>
    %240 = arith.addf %237, %239 : vector<8x128xf32>
    %cst_65 = arith.constant 0.000000e+00 : f32
    %241 = vector.broadcast %cst_65 : f32 to vector<8x128xf32>
    %242 = arith.maximumf %240, %241 : vector<8x128xf32>
    %c0_66 = arith.constant 0 : index
    %c0_67 = arith.constant 0 : index
    %243 = vector.load %arg4[%c0_66, %c0_67] : memref<128x128xf32, #tpu.memory_space<vmem>>, vector<128x128xf32>
    %cst_68 = arith.constant dense<0.000000e+00> : vector<8x128xf32>
    %244 = tpu.matmul %242, %243, %cst_68 {dimension_numbers = #tpu.dot_dimension_numbers<[1], [0], [0], [1], [0, 0, 1, 1], [], []>} : vector<8x128xf32>, vector<128x128xf32>, vector<8x128xf32> -> vector<8x128xf32>
    %c0_69 = arith.constant 0 : index
    %c0_70 = arith.constant 0 : index
    %245 = vector.load %arg5[%c0_69, %c0_70] : memref<1x128xf32, #tpu.memory_space<vmem>>, vector<1x128xf32>
    %246 = vector.broadcast %245 : vector<1x128xf32> to vector<8x128xf32>
    %247 = arith.addf %244, %246 : vector<8x128xf32>
    %c0_71 = arith.constant 0 : index
    %c0_72 = arith.constant 0 : index
    %248 = vector.load %arg6[%c0_71, %c0_72] : memref<8x128xf32, #tpu.memory_space<vmem>>, vector<8x128xf32>
    tpu.vector_store %arg6[%c0_71, %c0_72], %247 {strides = array<i32>} : memref<8x128xf32, #tpu.memory_space<vmem>>, vector<8x128xf32>,
    return
  }
}

</mosaic_0001>

<bundles_post_ra>
// kernel: tpu_custom_call.1
= control target key start
LH: loop header
LB: loop body
LE: loop exit
PB: predicated region body
PF: predicated region fallthrough
CT: control target
= control target key end

     0   :  { %11 = vsyncpa [#allocation3], 0  ;;  %s3045_s0 = inlined_call_operand.hbm [shape: f32[8,8,512], index: 0, kind: input, shape index: {}]   ;;  %s3046_s1 = inlined_call_operand.hbm [shape: f32[128,512], index: 1, kind: input, shape index: {}]   ;;  %s3047_s2 = inlined_call_operand.hbm [shape: f32[128,128], index: 2, kind: input, shape index: {}]   ;;  %s3048_s3 = inlined_call_operand.hbm [shape: f32[1,128], index: 3, kind: input, shape index: {}]   ;;  %s3049_s4 = inlined_call_operand.hbm [shape: f32[128,128], index: 4, kind: input, shape index: {}]   ;;  %s3050_s5 = inlined_call_operand.hbm [shape: f32[1,128], index: 5, kind: input, shape index: {}]   ;;  %s3051_s6 = inlined_call_operand.hbm [shape: f32[8,128], index: 6, kind: output, shape index: {}]  }
   0x1   :  { %12 = vsyncpa [#allocation6], 0 }
   0x2   :  { %13 = vsyncpa [#allocation9], 0 }
   0x3   :  { %14 = vsyncpa [#allocation12], 0 }
   0x4   :  { %15 = vsyncpa [#allocation4], 0  ;;  %s2543_s21 = smov [#allocation5]   ;;  %s2544_s23 = smov [#allocation8]  }
   0x5   :  { %s33_s22 = sshll.u32 %s2543_s21, 4  ;;  %s58_s24 = sshll.u32 %s2544_s23, 4  ;;  %s34_s22 = int_to_ptr.vmem [resolvable:$true] %s33_s22  ;;  %s2592_s24 = int_to_ptr.vmem [resolvable:$true] %s58_s24 }
   0x6   :  { %s2379_s27 = scalar_lea.hbm %s3046_s1, 8192 }
   0x7   :  { %p2380_p0 = scmp.ne.s32.totalorder %s3046_s1, %s2379_s27  ;;  %p2383_p1 = scmp.lt.u32.totalorder %s2379_s27, %s3046_s1 }
   0x9   :  { %p2385_p2 = pnand %p2383_p1, %p2380_p0 }
   0xb   :  { %2388 = shalt.err (!%p2385_p2)
}
   0xc   :  { %s2389_s8 = scalar_lea.vmem %s34_s22, 8192  ;;  %p2394_p4 = scmp.lt.s32.totalorder %s34_s22, %s34_s22 }
   0xd   :  { %p2390_p3 = scmp.ne.s32.totalorder %s34_s22, %s2389_s8  ;;  %p2395_p5 = scmp.lt.s32.totalorder %s2389_s8, %s2389_s8 }
   0xf   :  { %p2396_p6 = por %p2395_p5, %p2394_p4 }
  0x11   :  { %p2397_p7 = pnand %p2396_p6, %p2390_p3 }
  0x13   :  { %2400 = shalt.err (!%p2397_p7)
}
  0x14   :  { %s2545_s9 = smov 512   ;;  %s2546_s10 = smov 32  }
  0x15   :  { %39 = dma.hbm_to_vmem [thread:$0]  %s3046_s1, 8192, %s34_s22, [#allocation6], %s2545_s9, %s2545_s9, %s2546_s10  }
  0x16   :  { %s2401_s15 = scalar_lea.hbm %s3048_s3, 16 }
  0x17   :  { %p2402_p8 = scmp.ne.s32.totalorder %s3048_s3, %s2401_s15  ;;  %p2405_p9 = scmp.lt.u32.totalorder %s2401_s15, %s3048_s3 }
  0x19   :  { %p2407_p10 = pnand %p2405_p9, %p2402_p8 }
  0x1b   :  { %2410 = shalt.err (!%p2407_p10)
}
  0x1c   :  { %s2411_s20 = scalar_lea.vmem %s2592_s24, 16  ;;  %s2415_s1 = scalar_lea.vmem %s2592_s24, 32 }
  0x1d   :  { %p2412_p11 = scmp.ne.s32.totalorder %s2592_s24, %s2411_s20  ;;  %p2416_p12 = scmp.lt.s32.totalorder %s2592_s24, %s2592_s24 }
  0x1e   :  { %p2417_p13 = scmp.lt.s32.totalorder %s2415_s1, %s2411_s20 }
  0x20   :  { %p2418_p0 = por %p2417_p13, %p2416_p12 }
  0x22   :  { %p2419_p1 = pnand %p2418_p0, %p2412_p11 }
  0x24   :  { %2422 = shalt.err (!%p2419_p1)
}
  0x25   :  { %61 = dma.hbm_to_vmem [thread:$0]  %s3048_s3, 16, %s2592_s24, [#allocation9]  }
  0x26   :  { %s2547_s23 = smov [#allocation2]   ;;  %s2548_s26 = smov [#allocation7]  }
  0x27   :  { %s21_s25 = sshll.u32 %s2547_s23, 4  ;;  %s45_s27 = sshll.u32 %s2548_s26, 4  ;;  %s22_s25 = int_to_ptr.vmem [resolvable:$true] %s21_s25  ;;  %s2627_s27 = int_to_ptr.vmem [resolvable:$true] %s45_s27 }
  0x28   :  { %s2423_s30 = scalar_lea.hbm %s3045_s0, 4096 }
  0x29   :  { %p2424_p2 = scmp.ne.s32.totalorder %s3045_s0, %s2423_s30  ;;  %p2427_p3 = scmp.lt.u32.totalorder %s2423_s30, %s3045_s0 }
  0x2b   :  { %p2429_p4 = pnand %p2427_p3, %p2424_p2 }
  0x2d   :  { %2432 = shalt.err (!%p2429_p4)
}
  0x2e   :  { %s2433_s3 = scalar_lea.vmem %s22_s25, 4096  ;;  %p2438_p6 = scmp.lt.s32.totalorder %s22_s25, %s22_s25 }
  0x2f   :  { %p2434_p5 = scmp.ne.s32.totalorder %s22_s25, %s2433_s3  ;;  %p2439_p7 = scmp.lt.s32.totalorder %s2433_s3, %s2433_s3 }
  0x31   :  { %p2440_p8 = por %p2439_p7, %p2438_p6 }
  0x33   :  { %p2441_p9 = pnand %p2440_p8, %p2434_p5 }
  0x35   :  { %2444 = shalt.err (!%p2441_p9)
}
  0x36   :  { %27 = dma.hbm_to_vmem [thread:$0]  %s3045_s0, 4096, %s22_s25, [#allocation3], %s2545_s9, %s2545_s9, %s2546_s10  }
  0x37   :  { %s2445_s16 = scalar_lea.hbm %s3047_s2, 2048 }
  0x38   :  { %p2446_p10 = scmp.ne.s32.totalorder %s3047_s2, %s2445_s16  ;;  %p2449_p11 = scmp.lt.u32.totalorder %s2445_s16, %s3047_s2 }
  0x3a   :  { %p2451_p12 = pnand %p2449_p11, %p2446_p10 }
  0x3c   :  { %2454 = shalt.err (!%p2451_p12)
}
  0x3d   :  { %s2455_s1 = scalar_lea.vmem %s2627_s27, 2048  ;;  %p2460_p0 = scmp.lt.s32.totalorder %s2627_s27, %s2627_s27 }
  0x3e   :  { %p2456_p13 = scmp.ne.s32.totalorder %s2627_s27, %s2455_s1  ;;  %p2461_p1 = scmp.lt.s32.totalorder %s2455_s1, %s2455_s1 }
  0x40   :  { %p2462_p2 = por %p2461_p1, %p2460_p0 }
  0x42   :  { %p2463_p3 = pnand %p2462_p2, %p2456_p13 }
  0x44   :  { %2466 = shalt.err (!%p2463_p3)
}
  0x45   :  { %s2549_s0 = smov 128   ;;  %s2550_s9 = smov 8  }
  0x46   :  { %51 = dma.hbm_to_vmem [thread:$0]  %s3047_s2, 2048, %s2627_s27, [#allocation6], %s2549_s0, %s2549_s0, %s2550_s9  }
  0x47   :  { %s2551_s22 = smov [#allocation10]   ;;  %s2552_s25 = smov [#allocation11]  }
  0x48   :  { %s67_s23 = sshll.u32 %s2551_s22, 4  ;;  %s80_s26 = sshll.u32 %s2552_s25, 4  ;;  %s68_s23 = int_to_ptr.vmem [resolvable:$true] %s67_s23  ;;  %s81_s26 = int_to_ptr.vmem [resolvable:$true] %s80_s26 }
  0x49   :  { %s2467_s30 = scalar_lea.hbm %s3049_s4, 2048 }
  0x4a   :  { %p2468_p4 = scmp.ne.s32.totalorder %s3049_s4, %s2467_s30  ;;  %p2471_p5 = scmp.lt.u32.totalorder %s2467_s30, %s3049_s4 }
  0x4c   :  { %p2473_p6 = pnand %p2471_p5, %p2468_p4 }
  0x4e   :  { %2476 = shalt.err (!%p2473_p6)
}
  0x4f   :  { %s2477_s2 = scalar_lea.vmem %s68_s23, 2048  ;;  %p2482_p8 = scmp.lt.s32.totalorder %s68_s23, %s68_s23 }
  0x50   :  { %p2478_p7 = scmp.ne.s32.totalorder %s68_s23, %s2477_s2  ;;  %p2483_p9 = scmp.lt.s32.totalorder %s2477_s2, %s2477_s2 }
  0x52   :  { %p2484_p10 = por %p2483_p9, %p2482_p8 }
  0x54   :  { %p2485_p11 = pnand %p2484_p10, %p2478_p7 }
  0x56   :  { %2488 = shalt.err (!%p2485_p11)
}
  0x57   :  { %73 = dma.hbm_to_vmem [thread:$0]  %s3049_s4, 2048, %s68_s23, [#allocation9], %s2549_s0, %s2549_s0, %s2550_s9  }
  0x58   :  { %s2489_s14 = scalar_lea.hbm %s3050_s5, 16 }
  0x59   :  { %p2490_p12 = scmp.ne.s32.totalorder %s3050_s5, %s2489_s14  ;;  %p2493_p13 = scmp.lt.u32.totalorder %s2489_s14, %s3050_s5 }
  0x5b   :  { %p2495_p0 = pnand %p2493_p13, %p2490_p12 }
  0x5d   :  { %2498 = shalt.err (!%p2495_p0)
}
  0x5e   :  { %s2499_s19 = scalar_lea.vmem %s81_s26, 16  ;;  %s2503_s20 = scalar_lea.vmem %s81_s26, 32 }
  0x5f   :  { %p2500_p1 = scmp.ne.s32.totalorder %s81_s26, %s2499_s19  ;;  %p2504_p2 = scmp.lt.s32.totalorder %s81_s26, %s81_s26 }
  0x60   :  { %p2505_p3 = scmp.lt.s32.totalorder %s2503_s20, %s2499_s19 }
  0x62   :  { %p2506_p4 = por %p2505_p3, %p2504_p2 }
  0x64   :  { %p2507_p5 = pnand %p2506_p4, %p2500_p1 }
  0x66   :  { %2510 = shalt.err (!%p2507_p5)
}
  0x67   :  { %83 = dma.hbm_to_vmem [thread:$0]  %s3050_s5, 16, %s81_s26, [#allocation12]  }
  0x68   :  { %2533 = dma.done.wait [#allocation3], 4096  }
  0x69   :  { %2534 = vsyncadd [#allocation3], 4294963200 }
  0x6a   :  { %2535 = dma.done.wait [#allocation6], 10240  }
  0x6b   :  { %2536 = vsyncadd [#allocation6], 4294957056 }
  0x6c   :  { %2537 = dma.done.wait [#allocation9], 2064  }
  0x6d   :  { %2538 = vsyncadd [#allocation9], 4294965232 }
  0x6e   :  { %2539 = dma.done.wait [#allocation12], 16  }
  0x6f   :  { %2540 = vsyncadd [#allocation12], 4294967280  ;;  %v2553_v0 = vmov 0.0   ;;  %v127_v1 = vld [vmem:[#allocation5 + $0x8] sm:$0xff]  ;;  %v126_v3 = vld [vmem:[#allocation5] sm:$0xff]  ;;  %vm2555_vm0 = vmmov 0  }
  0x70   :  { %254 = vmatprep.mubr.f32.mxu0 %v2553_v0  ;;  %325 = vmatprep.mubr.f32.mxu1 %v2553_v0  ;;  %v131_v2 = vld [vmem:[#allocation5 + $0x28] sm:$0xff]  ;;  %v130_v5 = vld [vmem:[#allocation5 + $0x20] sm:$0xff]  ;;  %v129_v19 = vld [vmem:[#allocation5 + $0x18] sm:$0xff]  ;;  %s2556_s5 = smov [#allocation13]  }
  0x71   :  { %v2687_v4 = vpack.c.bf16 %v131_v2, %v127_v1  ;;  %v135_v6 = vld [vmem:[#allocation5 + $0x48] sm:$0xff]  ;;  %v2689_v8 = vpack.c.bf16 %v130_v5, %v126_v3  ;;  %v134_v10 = vld [vmem:[#allocation5 + $0x40] sm:$0xff]  ;;  %v133_v20 = vld [vmem:[#allocation5 + $0x38] sm:$0xff]  ;;  %s1604_s0 = sshll.u32 %s2556_s5, 4  ;;  %s1605_s0 = int_to_ptr.vmem [resolvable:$true] %s1604_s0 }
  0x72   :  { %v139_v7 = vld [vmem:[#allocation5 + $0x68] sm:$0xff]  ;;  %v138_v11 = vld [vmem:[#allocation5 + $0x60] sm:$0xff]  ;;  %v2700_v22 = vpack.c.bf16 %v133_v20, %v129_v19  ;;  %v128_v23 = vld [vmem:[#allocation5 + $0x10] sm:$0xff]  ;;  %s2511_s9 = scalar_lea.vmem %s1605_s0, 128  ;;  %p2516_p7 = scmp.lt.s32.totalorder %s1605_s0, %s1605_s0 }
  0x73   :  { %v2691_v9 = vpack.c.bf16 %v139_v7, %v135_v6  ;;  %v143_v12 = vld [vmem:[#allocation5 + $0x88] sm:$0xff]  ;;  %1746 = vmatprep.subr.bf16.mxu0 %v2687_v4  ;;  %v2695_v14 = vpack.c.bf16 %v138_v11, %v134_v10  ;;  %v142_v15 = vld [vmem:[#allocation5 + $0x80] sm:$0xff]  ;;  %v132_v24 = vld [vmem:[#allocation5 + $0x30] sm:$0xff]  ;;  %p2512_p6 = scmp.ne.s32.totalorder %s1605_s0, %s2511_s9  ;;  %p2517_p8 = scmp.lt.s32.totalorder %s2511_s9, %s2511_s9 }
  0x74   :  { %v147_v13 = vld [vmem:[#allocation5 + $0xa8] sm:$0xff]  ;;  %1748 = vmatpush1.bf16.msra.mxu0 %v2689_v8  ;;  %v146_v16 = vld [vmem:[#allocation5 + $0xa0] sm:$0xff]  ;;  %v2702_v25 = vpack.c.bf16 %v132_v24, %v128_v23  ;;  %1778 = vmatprep.subr.bf16.mxu1 %v2700_v22  ;;  %v137_v27 = vld [vmem:[#allocation5 + $0x58] sm:$0xff] }
  0x75   :  { %1750 = vmatprep.subr.bf16.mxu0 %v2691_v9  ;;  %v2698_v17 = vpack.c.bf16 %v147_v13, %v143_v12  ;;  %v151_v18 = vld [vmem:[#allocation5 + $0xc8] sm:$0xff]  ;;  %v2705_v26 = vpack.c.bf16 %v146_v16, %v142_v15  ;;  %v141_v28 = vld [vmem:[#allocation5 + $0x78] sm:$0xff]  ;;  %v136_v29 = vld [vmem:[#allocation5 + $0x50] sm:$0xff]  ;;  %p2518_p9 = por %p2517_p8, %p2516_p7 }
  0x76   :  { %v155_v21 = vld [vmem:[#allocation5 + $0xe8] sm:$0xff]  ;;  %v150_v31 = vld [vmem:[#allocation5 + $0xc0] sm:$0xff]  ;;  %1780 = vmatpush1.bf16.msra.mxu1 %v2702_v25  ;;  %v2712_v33 = vpack.c.bf16 %v141_v28, %v137_v27  ;;  %v140_v34 = vld [vmem:[#allocation5 + $0x70] sm:$0xff] }
  0x77   :  { %v2709_v30 = vpack.c.bf16 %v155_v21, %v151_v18  ;;  %v154_v32 = vld [vmem:[#allocation5 + $0xe0] sm:$0xff]  ;;  %v159_v35 = vld [vmem:[#allocation5 + $0x108] sm:$0xff]  ;;  %v2714_v37 = vpack.c.bf16 %v140_v34, %v136_v29  ;;  %v145_v38 = vld [vmem:[#allocation5 + $0x98] sm:$0xff]  ;;  %p2519_p10 = pnand %p2518_p9, %p2512_p6 }
  0x78   :  { %1752 = vmatpush1.bf16.msra.mxu0 %v2695_v14  ;;  %v163_v36 = vld [vmem:[#allocation5 + $0x128] sm:$0xff]  ;;  %1782 = vmatprep.subr.bf16.mxu1 %v2712_v33  ;;  %v149_v39 = vld [vmem:[#allocation5 + $0xb8] sm:$0xff]  ;;  %v144_v40 = vld [vmem:[#allocation5 + $0x90] sm:$0xff]  ;;  %v2718_v42 = vpack.c.bf16 %v154_v32, %v150_v31 }
  0x79   :  { %1754 = vmatprep.subr.bf16.mxu0 %v2698_v17  ;;  %v148_v41 = vld [vmem:[#allocation5 + $0xb0] sm:$0xff]  ;;  %v158_v43 = vld [vmem:[#allocation5 + $0x100] sm:$0xff]  ;;  %v2720_v45 = vpack.c.bf16 %v149_v39, %v145_v38  ;;  %v2723_v46 = vpack.c.bf16 %v163_v36, %v159_v35  ;;  %v167_v47 = vld [vmem:[#allocation5 + $0x148] sm:$0xff] }
  0x7a   :  { %v162_v44 = vld [vmem:[#allocation5 + $0x120] sm:$0xff]  ;;  %1784 = vmatpush1.bf16.msra.mxu1 %v2714_v37  ;;  %v2726_v48 = vpack.c.bf16 %v148_v41, %v144_v40  ;;  %v153_v49 = vld [vmem:[#allocation5 + $0xd8] sm:$0xff]  ;;  %v171_v51 = vld [vmem:[#allocation5 + $0x168] sm:$0xff] }
  0x7b   :  { %v157_v50 = vld [vmem:[#allocation5 + $0xf8] sm:$0xff]  ;;  %1786 = vmatprep.subr.bf16.mxu1 %v2720_v45  ;;  %v152_v53 = vld [vmem:[#allocation5 + $0xd0] sm:$0xff]  ;;  %v2732_v55 = vpack.c.bf16 %v162_v44, %v158_v43  ;;  %v166_v56 = vld [vmem:[#allocation5 + $0x140] sm:$0xff]  ;;  %v2735_v59 = vpack.c.bf16 %v171_v51, %v167_v47 }
  0x7c   :  { %1756 = vmatpush1.bf16.msra.mxu0 %v2705_v26  ;;  %v2729_v52 = vpack.c.bf16 %v157_v50, %v153_v49  ;;  %v156_v54 = vld [vmem:[#allocation5 + $0xf0] sm:$0xff]  ;;  %v161_v57 = vld [vmem:[#allocation5 + $0x118] sm:$0xff]  ;;  %v170_v60 = vld [vmem:[#allocation5 + $0x160] sm:$0xff] }
  0x7d   :  { %1758 = vmatprep.subr.bf16.mxu0 %v2709_v30  ;;  %v165_v58 = vld [vmem:[#allocation5 + $0x138] sm:$0xff]  ;;  %v175_v61 = vld [vmem:[#allocation5 + $0x188] sm:$0xff]  ;;  %v2738_v62 = vpack.c.bf16 %v156_v54, %v152_v53  ;;  %v102_v63 = vld [vmem:[#allocation2] sm:$0xff]  ;;  %v2744_v11 = vpack.c.bf16 %v170_v60, %v166_v56 }
  0x7e   :  { %1788 = vmatpush1.bf16.msra.mxu1 %v2726_v48  ;;  %v179_v1 = vld [vmem:[#allocation5 + $0x1a8] sm:$0xff]  ;;  %v2741_v2 = vpack.c.bf16 %v165_v58, %v161_v57  ;;  %v160_v3 = vld [vmem:[#allocation5 + $0x110] sm:$0xff]  ;;  %v1616_v6 = vmul.f32 -1.442695, %v102_v63  ;;  %v169_v7 = vld [vmem:[#allocation5 + $0x158] sm:$0xff] }
  0x7f   :  { %1790 = vmatprep.subr.bf16.mxu1 %v2729_v52  ;;  %v164_v5 = vld [vmem:[#allocation5 + $0x130] sm:$0xff]  ;;  %v173_v10 = vld [vmem:[#allocation5 + $0x178] sm:$0xff]  ;;  %v2747_v13 = vpack.c.bf16 %v179_v1, %v175_v61  ;;  %v174_v15 = vld [vmem:[#allocation5 + $0x180] sm:$0xff] }
  0x80   :  { %1760 = vmatpush1.bf16.msra.mxu0 %v2718_v42  ;;  %v104_v12 = vld [vmem:[#allocation2 + $0x18] sm:$0xff]  ;;  %2255 = vpow2.f32 %v1616_v6  ;;  %v178_v16 = vld [vmem:[#allocation5 + $0x1a0] sm:$0xff]  ;;  %v183_v18 = vld [vmem:[#allocation5 + $0x1c8] sm:$0xff]  ;;  %v2750_v19 = vpack.c.bf16 %v164_v5, %v160_v3  ;;  %v2753_v21 = vpack.c.bf16 %v173_v10, %v169_v7 }
  0x81   :  { %1762 = vmatprep.subr.bf16.mxu0 %v2723_v46  ;;  %v187_v20 = vld [vmem:[#allocation5 + $0x1e8] sm:$0xff]  ;;  %v168_v23 = vld [vmem:[#allocation5 + $0x150] sm:$0xff]  ;;  %v1617_v27 = vmul.f32 -1.442695, %v104_v12  ;;  %v177_v28 = vld [vmem:[#allocation5 + $0x198] sm:$0xff]  ;;  %v2756_v31 = vpack.c.bf16 %v178_v16, %v174_v15 }
  0x82   :  { %1792 = vmatpush1.bf16.msra.mxu1 %v2738_v62  ;;  %v172_v24 = vld [vmem:[#allocation5 + $0x170] sm:$0xff]  ;;  %v181_v29 = vld [vmem:[#allocation5 + $0x1b8] sm:$0xff]  ;;  %v2759_v32 = vpack.c.bf16 %v187_v20, %v183_v18  ;;  %v182_v34 = vld [vmem:[#allocation5 + $0x1c0] sm:$0xff] }
  0x83   :  { %1794 = vmatprep.subr.bf16.mxu1 %v2741_v2  ;;  %v186_v35 = vld [vmem:[#allocation5 + $0x1e0] sm:$0xff]  ;;  %v2762_v36 = vpack.c.bf16 %v172_v24, %v168_v23  ;;  %v2765_v38 = vpack.c.bf16 %v181_v29, %v177_v28  ;;  %v176_v39 = vld [vmem:[#allocation5 + $0x190] sm:$0xff]  ;;  %2257 = vpow2.f32 %v1617_v27  ;;  %v185_v41 = vld [vmem:[#allocation5 + $0x1d8] sm:$0xff] }
  0x84   :  { %1764 = vmatpush1.bf16.msra.mxu0 %v2732_v55  ;;  %v180_v40 = vld [vmem:[#allocation5 + $0x1b0] sm:$0xff]  ;;  %v189_v43 = vld [vmem:[#allocation5 + $0x1f8] sm:$0xff]  ;;  %v2768_v44 = vpack.c.bf16 %v186_v35, %v182_v34  ;;  %v122_v7 = vld [vmem:[#allocation2 + $0x20] sm:$0xff] }
  0x85   :  { %1766 = vmatprep.subr.bf16.mxu0 %v2735_v59  ;;  %v103_v47 = vld [vmem:[#allocation2 + $0x10] sm:$0xff]  ;;  %v2772_v49 = vpack.c.bf16 %v180_v40, %v176_v39  ;;  %v2775_v51 = vpack.c.bf16 %v189_v43, %v185_v41  ;;  %v123_v10 = vld [vmem:[#allocation2 + $0x28] sm:$0xff]  ;;  %v125_v28 = vld [vmem:[#allocation2 + $0x38] sm:$0xff] }
  0x86   :  { %1796 = vmatpush1.bf16.msra.mxu1 %v2750_v19  ;;  %v184_v53 = vld [vmem:[#allocation5 + $0x1d0] sm:$0xff]  ;;  %2259 = vtanh.f32 %v103_v47 }
  0x87   :  { %1798 = vmatprep.subr.bf16.mxu1 %v2753_v21  ;;  %v188_v54 = vld [vmem:[#allocation5 + $0x1f0] sm:$0xff] }
  0x88   :  { %1768 = vmatpush1.bf16.msra.mxu0 %v2744_v11  ;;  %v2779_v57 = vpack.c.bf16 %v188_v54, %v184_v53  ;;  %v124_v34 = vld [vmem:[#allocation2 + $0x30] sm:$0xff] }
  0x89   :  { %1770 = vmatprep.subr.bf16.mxu0 %v2747_v13 }
  0x8a   :  { %1800 = vmatpush1.bf16.msra.mxu1 %v2762_v36  ;;  %v2256_v50 = vpop.eup %2255 }
  0x8b   :  { %1802 = vmatprep.subr.bf16.mxu1 %v2765_v38  ;;  %v108_v56 = vadd.f32 1.0, %v2256_v50 }
  0x8c   :  { %1772 = vmatpush1.bf16.msra.mxu0 %v2756_v31 }
  0x8d   :  { %1774 = vmatprep.subr.bf16.mxu0 %v2759_v32  ;;  %2261 = vrcp.f32 %v108_v56  ;;  %v2258_v58 = vpop.eup %2257 }
  0x8e   :  { %1804 = vmatpush1.bf16.msra.mxu1 %v2772_v49  ;;  %v115_v60 = vadd.f32 1.0, %v2258_v58 }
  0x8f   :  { %1806 = vmatprep.subr.bf16.mxu1 %v2775_v51 }
  0x90   :  { %1776 = vmatpush1.bf16.msra.mxu0 %v2768_v44  ;;  %v2260_v61 = vpop.eup %2259  ;;  %2263 = vrcp.f32 %v115_v60 }
  0x91   :  { %1810 = vmatprep.subr.bf16.mxu0 %v2687_v4 }
  0x92   :  { %1808 = vmatpush1.bf16.msra.mxu1 %v2779_v57 }
  0x93   :  { %1842 = vmatprep.subr.bf16.mxu1 %v2700_v22 }
  0x97   :  { %v2262_v63 = vpop.eup %2261 }
  0x98   :  { %v2785_v1 = vmul.f32 %v2262_v63, %v2260_v61 }
  0x9a   :  { %2265 = vtanh.f32 %v2785_v1  ;;  %v2264_v3 = vpop.eup %2263 }
  0xa4   :  { %v2266_v5 = vpop.eup %2265 }
  0xa5   :  { %v120_v6 = vmul.f32 %v2266_v5, %v2264_v3 }
  0xa7   :  { %255 = vmatmul.mubr.f32.vlgmr.msra.gmra.mrb[0].mxu0 %v120_v6  ;;  %326 = vmatmul.mubr.f32.vlgmr.msra.gmra.mrb[0].mxu1 %v120_v6 }
  0xa8   :  { %1812 = vmatpush1.bf16.msra.mxu0 %v2689_v8  ;;  %1844 = vmatpush1.bf16.msra.mxu1 %v2702_v25 }
  0xa9   :  { %1814 = vmatprep.subr.bf16.mxu0 %v2691_v9  ;;  %1846 = vmatprep.subr.bf16.mxu1 %v2712_v33 }
  0xaa   :  { %429 = vmatprep.mubr.f32.mxu0 %v2553_v0  ;;  %500 = vmatprep.mubr.f32.mxu1 %v2553_v0 }
  0xac   :  { %1816 = vmatpush1.bf16.msra.mxu0 %v2695_v14  ;;  %1848 = vmatpush1.bf16.msra.mxu1 %v2714_v37 }
  0xad   :  { %1818 = vmatprep.subr.bf16.mxu0 %v2698_v17  ;;  %1850 = vmatprep.subr.bf16.mxu1 %v2720_v45 }
  0xb0   :  { %1820 = vmatpush1.bf16.msra.mxu0 %v2705_v26  ;;  %1852 = vmatpush1.bf16.msra.mxu1 %v2726_v48 }
  0xb1   :  { %1822 = vmatprep.subr.bf16.mxu0 %v2709_v30  ;;  %1854 = vmatprep.subr.bf16.mxu1 %v2729_v52 }
  0xb4   :  { %1824 = vmatpush1.bf16.msra.mxu0 %v2718_v42  ;;  %1856 = vmatpush1.bf16.msra.mxu1 %v2738_v62 }
  0xb5   :  { %1826 = vmatprep.subr.bf16.mxu0 %v2723_v46  ;;  %1858 = vmatprep.subr.bf16.mxu1 %v2741_v2 }
  0xb8   :  { %1828 = vmatpush1.bf16.msra.mxu0 %v2732_v55  ;;  %1860 = vmatpush1.bf16.msra.mxu1 %v2750_v19 }
  0xb9   :  { %1830 = vmatprep.subr.bf16.mxu0 %v2735_v59  ;;  %1862 = vmatprep.subr.bf16.mxu1 %v2753_v21 }
  0xbc   :  { %1832 = vmatpush1.bf16.msra.mxu0 %v2744_v11  ;;  %1864 = vmatpush1.bf16.msra.mxu1 %v2762_v36 }
  0xbd   :  { %1834 = vmatprep.subr.bf16.mxu0 %v2747_v13  ;;  %1866 = vmatprep.subr.bf16.mxu1 %v2765_v38 }
  0xc0   :  { %1836 = vmatpush1.bf16.msra.mxu0 %v2756_v31  ;;  %1868 = vmatpush1.bf16.msra.mxu1 %v2772_v49 }
  0xc1   :  { %1838 = vmatprep.subr.bf16.mxu0 %v2759_v32  ;;  %1870 = vmatprep.subr.bf16.mxu1 %v2775_v51 }
  0xc4   :  { %1840 = vmatpush1.bf16.msra.mxu0 %v2768_v44  ;;  %1872 = vmatpush1.bf16.msra.mxu1 %v2779_v57 }
  0xc5   :  { %1874 = vmatprep.subr.bf16.mxu0 %v2687_v4  ;;  %1906 = vmatprep.subr.bf16.mxu1 %v2700_v22 }
 0x17a   :  { %v256_v12 = vpop.f32.mrb[0].mxu0  ;;  %v327_v15 = vpop.f32.mrb[0].mxu1 }
 0x17b   :  { %v332_v16 = vadd.f32 %v256_v12, %v122_v7  ;;  %v258_v18 = vpop.f32.mrb[1].mxu0  ;;  %v329_v20 = vpop.f32.mrb[1].mxu1  ;;  %v334_v39 = vadd.f32 %v327_v15, %v124_v34  ;;  %v362_v7 = vld [vmem:[#allocation2 + $0x48] sm:$0xff] }
 0x17c   :  { %v333_v23 = vadd.f32 %v258_v18, %v123_v10  ;;  %v335_v29 = vadd.f32 %v329_v20, %v125_v28 }
 0x17d   :  { %v1618_v24 = vmul.f32 -1.442695, %v332_v16 }
 0x17e   :  { %v1619_v27 = vmul.f32 -1.442695, %v333_v23  ;;  %v1620_v35 = vmul.f32 -1.442695, %v335_v29  ;;  %v363_v29 = vld [vmem:[#allocation2 + $0x50] sm:$0xff] }
 0x17f   :  { %2267 = vpow2.f32 %v1618_v24 }
 0x180   :  { %2269 = vpow2.f32 %v1619_v27  ;;  %v364_v27 = vld [vmem:[#allocation2 + $0x58] sm:$0xff] }
 0x181   :  { %2271 = vpow2.f32 %v1620_v35 }
 0x182   :  { %2273 = vtanh.f32 %v334_v39 }
 0x189   :  { %v2268_v40 = vpop.eup %2267 }
 0x18a   :  { %v2270_v41 = vpop.eup %2269  ;;  %v339_v43 = vadd.f32 1.0, %v2268_v40 }
 0x18b   :  { %v345_v47 = vadd.f32 1.0, %v2270_v41  ;;  %v2272_v50 = vpop.eup %2271 }
 0x18c   :  { %2275 = vrcp.f32 %v339_v43  ;;  %v2274_v53 = vpop.eup %2273  ;;  %v352_v56 = vadd.f32 1.0, %v2272_v50 }
 0x18d   :  { %2277 = vrcp.f32 %v345_v47 }
 0x18e   :  { %2279 = vrcp.f32 %v352_v56 }
 0x196   :  { %v2276_v54 = vpop.eup %2275 }
 0x197   :  { %v2278_v58 = vpop.eup %2277  ;;  %v356_v60 = vmul.f32 %v2276_v54, %v2274_v53 }
 0x198   :  { %v355_v61 = vmul.f32 %v2278_v58, %v2785_v1  ;;  %v2280_v3 = vpop.eup %2279  ;;  %v361_v1 = vld [vmem:[#allocation2 + $0x40] sm:$0xff] }
 0x19a   :  { %v2823_v63 = vadd.f32 %v356_v60, %v355_v61 }
 0x19c   :  { %2281 = vtanh.f32 %v2823_v63 }
 0x1a6   :  { %v2282_v5 = vpop.eup %2281 }
 0x1a7   :  { %v359_v6 = vmul.f32 %v2282_v5, %v2280_v3 }
 0x1a9   :  { %430 = vmatmul.mubr.f32.vlgmr.msra.gmra.mrb[2].mxu0 %v359_v6  ;;  %501 = vmatmul.mubr.f32.vlgmr.msra.gmra.mrb[2].mxu1 %v359_v6 }
 0x1aa   :  { %1876 = vmatpush1.bf16.msra.mxu0 %v2689_v8  ;;  %1908 = vmatpush1.bf16.msra.mxu1 %v2702_v25 }
 0x1ab   :  { %1878 = vmatprep.subr.bf16.mxu0 %v2691_v9  ;;  %1910 = vmatprep.subr.bf16.mxu1 %v2712_v33 }
 0x1ac   :  { %604 = vmatprep.mubr.f32.mxu0 %v2553_v0  ;;  %675 = vmatprep.mubr.f32.mxu1 %v2553_v0 }
 0x1ae   :  { %1880 = vmatpush1.bf16.msra.mxu0 %v2695_v14  ;;  %1912 = vmatpush1.bf16.msra.mxu1 %v2714_v37 }
 0x1af   :  { %1882 = vmatprep.subr.bf16.mxu0 %v2698_v17  ;;  %1914 = vmatprep.subr.bf16.mxu1 %v2720_v45 }
 0x1b2   :  { %1884 = vmatpush1.bf16.msra.mxu0 %v2705_v26  ;;  %1916 = vmatpush1.bf16.msra.mxu1 %v2726_v48 }
 0x1b3   :  { %1886 = vmatprep.subr.bf16.mxu0 %v2709_v30  ;;  %1918 = vmatprep.subr.bf16.mxu1 %v2729_v52 }
 0x1b6   :  { %1888 = vmatpush1.bf16.msra.mxu0 %v2718_v42  ;;  %1920 = vmatpush1.bf16.msra.mxu1 %v2738_v62 }
 0x1b7   :  { %1890 = vmatprep.subr.bf16.mxu0 %v2723_v46  ;;  %1922 = vmatprep.subr.bf16.mxu1 %v2741_v2 }
 0x1ba   :  { %1892 = vmatpush1.bf16.msra.mxu0 %v2732_v55  ;;  %1924 = vmatpush1.bf16.msra.mxu1 %v2750_v19 }
 0x1bb   :  { %1894 = vmatprep.subr.bf16.mxu0 %v2735_v59  ;;  %1926 = vmatprep.subr.bf16.mxu1 %v2753_v21 }
 0x1be   :  { %1896 = vmatpush1.bf16.msra.mxu0 %v2744_v11  ;;  %1928 = vmatpush1.bf16.msra.mxu1 %v2762_v36 }
 0x1bf   :  { %1898 = vmatprep.subr.bf16.mxu0 %v2747_v13  ;;  %1930 = vmatprep.subr.bf16.mxu1 %v2765_v38 }
 0x1c2   :  { %1900 = vmatpush1.bf16.msra.mxu0 %v2756_v31  ;;  %1932 = vmatpush1.bf16.msra.mxu1 %v2772_v49 }
 0x1c3   :  { %1902 = vmatprep.subr.bf16.mxu0 %v2759_v32  ;;  %1934 = vmatprep.subr.bf16.mxu1 %v2775_v51 }
 0x1c6   :  { %1904 = vmatpush1.bf16.msra.mxu0 %v2768_v44  ;;  %1936 = vmatpush1.bf16.msra.mxu1 %v2779_v57 }
 0x1c7   :  { %1938 = vmatprep.subr.bf16.mxu0 %v2687_v4  ;;  %1970 = vmatprep.subr.bf16.mxu1 %v2700_v22 }
 0x27c   :  { %v431_v10 = vpop.f32.mrb[2].mxu0  ;;  %v502_v12 = vpop.f32.mrb[2].mxu1 }
 0x27d   :  { %v507_v15 = vadd.f32 %v431_v10, %v361_v1  ;;  %v433_v16 = vpop.f32.mrb[3].mxu0  ;;  %v504_v18 = vpop.f32.mrb[3].mxu1  ;;  %v509_v35 = vadd.f32 %v502_v12, %v363_v29  ;;  %v537_v1 = vld [vmem:[#allocation2 + $0x68] sm:$0xff] }
 0x27e   :  { %v508_v20 = vadd.f32 %v433_v16, %v362_v7  ;;  %v510_v28 = vadd.f32 %v504_v18, %v364_v27 }
 0x27f   :  { %v1621_v23 = vmul.f32 -1.442695, %v507_v15 }
 0x280   :  { %v1622_v24 = vmul.f32 -1.442695, %v508_v20  ;;  %v1623_v34 = vmul.f32 -1.442695, %v510_v28  ;;  %v538_v28 = vld [vmem:[#allocation2 + $0x70] sm:$0xff] }
 0x281   :  { %2283 = vpow2.f32 %v1621_v23 }
 0x282   :  { %2285 = vpow2.f32 %v1622_v24  ;;  %v539_v24 = vld [vmem:[#allocation2 + $0x78] sm:$0xff] }
 0x283   :  { %2287 = vpow2.f32 %v1623_v34 }
 0x284   :  { %2289 = vtanh.f32 %v509_v35 }
 0x28b   :  { %v2284_v39 = vpop.eup %2283 }
 0x28c   :  { %v2286_v40 = vpop.eup %2285  ;;  %v514_v41 = vadd.f32 1.0, %v2284_v39 }
 0x28d   :  { %v520_v43 = vadd.f32 1.0, %v2286_v40  ;;  %v2288_v47 = vpop.eup %2287 }
 0x28e   :  { %2291 = vrcp.f32 %v514_v41  ;;  %v2290_v50 = vpop.eup %2289  ;;  %v527_v58 = vadd.f32 1.0, %v2288_v47 }
 0x28f   :  { %2293 = vrcp.f32 %v520_v43 }
 0x290   :  { %2295 = vrcp.f32 %v527_v58 }
 0x298   :  { %v2292_v53 = vpop.eup %2291 }
 0x299   :  { %v2294_v54 = vpop.eup %2293  ;;  %v531_v56 = vmul.f32 %v2292_v53, %v2290_v50 }
 0x29a   :  { %v530_v60 = vmul.f32 %v2294_v54, %v2823_v63  ;;  %v2296_v3 = vpop.eup %2295  ;;  %v536_v63 = vld [vmem:[#allocation2 + $0x60] sm:$0xff] }
 0x29c   :  { %v2861_v61 = vadd.f32 %v531_v56, %v530_v60 }
 0x29e   :  { %2297 = vtanh.f32 %v2861_v61 }
 0x2a8   :  { %v2298_v5 = vpop.eup %2297 }
 0x2a9   :  { %v534_v6 = vmul.f32 %v2298_v5, %v2296_v3 }
 0x2ab   :  { %605 = vmatmul.mubr.f32.vlgmr.msra.gmra.mrb[4].mxu0 %v534_v6  ;;  %676 = vmatmul.mubr.f32.vlgmr.msra.gmra.mrb[4].mxu1 %v534_v6 }
 0x2ac   :  { %1940 = vmatpush1.bf16.msra.mxu0 %v2689_v8  ;;  %1972 = vmatpush1.bf16.msra.mxu1 %v2702_v25 }
 0x2ad   :  { %1942 = vmatprep.subr.bf16.mxu0 %v2691_v9  ;;  %1974 = vmatprep.subr.bf16.mxu1 %v2712_v33 }
 0x2ae   :  { %779 = vmatprep.mubr.f32.mxu0 %v2553_v0  ;;  %850 = vmatprep.mubr.f32.mxu1 %v2553_v0 }
 0x2b0   :  { %1944 = vmatpush1.bf16.msra.mxu0 %v2695_v14  ;;  %1976 = vmatpush1.bf16.msra.mxu1 %v2714_v37 }
 0x2b1   :  { %1946 = vmatprep.subr.bf16.mxu0 %v2698_v17  ;;  %1978 = vmatprep.subr.bf16.mxu1 %v2720_v45 }
 0x2b4   :  { %1948 = vmatpush1.bf16.msra.mxu0 %v2705_v26  ;;  %1980 = vmatpush1.bf16.msra.mxu1 %v2726_v48 }
 0x2b5   :  { %1950 = vmatprep.subr.bf16.mxu0 %v2709_v30  ;;  %1982 = vmatprep.subr.bf16.mxu1 %v2729_v52 }
 0x2b8   :  { %1952 = vmatpush1.bf16.msra.mxu0 %v2718_v42  ;;  %1984 = vmatpush1.bf16.msra.mxu1 %v2738_v62 }
 0x2b9   :  { %1954 = vmatprep.subr.bf16.mxu0 %v2723_v46  ;;  %1986 = vmatprep.subr.bf16.mxu1 %v2741_v2 }
 0x2bc   :  { %1956 = vmatpush1.bf16.msra.mxu0 %v2732_v55  ;;  %1988 = vmatpush1.bf16.msra.mxu1 %v2750_v19 }
 0x2bd   :  { %1958 = vmatprep.subr.bf16.mxu0 %v2735_v59  ;;  %1990 = vmatprep.subr.bf16.mxu1 %v2753_v21 }
 0x2c0   :  { %1960 = vmatpush1.bf16.msra.mxu0 %v2744_v11  ;;  %1992 = vmatpush1.bf16.msra.mxu1 %v2762_v36 }
 0x2c1   :  { %1962 = vmatprep.subr.bf16.mxu0 %v2747_v13  ;;  %1994 = vmatprep.subr.bf16.mxu1 %v2765_v38 }
 0x2c4   :  { %1964 = vmatpush1.bf16.msra.mxu0 %v2756_v31  ;;  %1996 = vmatpush1.bf16.msra.mxu1 %v2772_v49 }
 0x2c5   :  { %1966 = vmatprep.subr.bf16.mxu0 %v2759_v32  ;;  %1998 = vmatprep.subr.bf16.mxu1 %v2775_v51 }
 0x2c8   :  { %1968 = vmatpush1.bf16.msra.mxu0 %v2768_v44  ;;  %2000 = vmatpush1.bf16.msra.mxu1 %v2779_v57 }
 0x2c9   :  { %2002 = vmatprep.subr.bf16.mxu0 %v2687_v4  ;;  %2034 = vmatprep.subr.bf16.mxu1 %v2700_v22 }
 0x37e   :  { %v606_v7 = vpop.f32.mrb[4].mxu0  ;;  %v677_v10 = vpop.f32.mrb[4].mxu1 }
 0x37f   :  { %v682_v12 = vadd.f32 %v606_v7, %v536_v63  ;;  %v608_v15 = vpop.f32.mrb[5].mxu0  ;;  %v679_v16 = vpop.f32.mrb[5].mxu1  ;;  %v684_v34 = vadd.f32 %v677_v10, %v538_v28  ;;  %v712_v63 = vld [vmem:[#allocation2 + $0x88] sm:$0xff] }
 0x380   :  { %v683_v18 = vadd.f32 %v608_v15, %v537_v1  ;;  %v685_v27 = vadd.f32 %v679_v16, %v539_v24 }
 0x381   :  { %v1624_v20 = vmul.f32 -1.442695, %v682_v12 }
 0x382   :  { %v1625_v23 = vmul.f32 -1.442695, %v683_v18  ;;  %v1626_v29 = vmul.f32 -1.442695, %v685_v27  ;;  %v713_v27 = vld [vmem:[#allocation2 + $0x90] sm:$0xff] }
 0x383   :  { %2299 = vpow2.f32 %v1624_v20 }
 0x384   :  { %2301 = vpow2.f32 %v1625_v23  ;;  %v714_v23 = vld [vmem:[#allocation2 + $0x98] sm:$0xff] }
 0x385   :  { %2303 = vpow2.f32 %v1626_v29 }
 0x386   :  { %2305 = vtanh.f32 %v684_v34 }
 0x38d   :  { %v2300_v35 = vpop.eup %2299 }
 0x38e   :  { %v2302_v39 = vpop.eup %2301  ;;  %v689_v40 = vadd.f32 1.0, %v2300_v35 }
 0x38f   :  { %v695_v41 = vadd.f32 1.0, %v2302_v39  ;;  %v2304_v43 = vpop.eup %2303 }
 0x390   :  { %2307 = vrcp.f32 %v689_v40  ;;  %v2306_v47 = vpop.eup %2305  ;;  %v702_v56 = vadd.f32 1.0, %v2304_v43 }
 0x391   :  { %2309 = vrcp.f32 %v695_v41 }
 0x392   :  { %2311 = vrcp.f32 %v702_v56 }
 0x39a   :  { %v2308_v50 = vpop.eup %2307 }
 0x39b   :  { %v2310_v53 = vpop.eup %2309  ;;  %v706_v54 = vmul.f32 %v2308_v50, %v2306_v47 }
 0x39c   :  { %v705_v58 = vmul.f32 %v2310_v53, %v2861_v61  ;;  %v2312_v3 = vpop.eup %2311  ;;  %v711_v61 = vld [vmem:[#allocation2 + $0x80] sm:$0xff] }
 0x39e   :  { %v2899_v60 = vadd.f32 %v706_v54, %v705_v58 }
 0x3a0   :  { %2313 = vtanh.f32 %v2899_v60 }
 0x3aa   :  { %v2314_v5 = vpop.eup %2313 }
 0x3ab   :  { %v709_v6 = vmul.f32 %v2314_v5, %v2312_v3 }
 0x3ad   :  { %780 = vmatmul.mubr.f32.vlgmr.msra.gmra.mrb[6].mxu0 %v709_v6  ;;  %851 = vmatmul.mubr.f32.vlgmr.msra.gmra.mrb[6].mxu1 %v709_v6 }
 0x3ae   :  { %2004 = vmatpush1.bf16.msra.mxu0 %v2689_v8  ;;  %2036 = vmatpush1.bf16.msra.mxu1 %v2702_v25 }
 0x3af   :  { %2006 = vmatprep.subr.bf16.mxu0 %v2691_v9  ;;  %2038 = vmatprep.subr.bf16.mxu1 %v2712_v33 }
 0x3b0   :  { %954 = vmatprep.mubr.f32.mxu0 %v2553_v0  ;;  %1025 = vmatprep.mubr.f32.mxu1 %v2553_v0 }
 0x3b2   :  { %2008 = vmatpush1.bf16.msra.mxu0 %v2695_v14  ;;  %2040 = vmatpush1.bf16.msra.mxu1 %v2714_v37 }
 0x3b3   :  { %2010 = vmatprep.subr.bf16.mxu0 %v2698_v17  ;;  %2042 = vmatprep.subr.bf16.mxu1 %v2720_v45 }
 0x3b6   :  { %2012 = vmatpush1.bf16.msra.mxu0 %v2705_v26  ;;  %2044 = vmatpush1.bf16.msra.mxu1 %v2726_v48 }
 0x3b7   :  { %2014 = vmatprep.subr.bf16.mxu0 %v2709_v30  ;;  %2046 = vmatprep.subr.bf16.mxu1 %v2729_v52 }
 0x3ba   :  { %2016 = vmatpush1.bf16.msra.mxu0 %v2718_v42  ;;  %2048 = vmatpush1.bf16.msra.mxu1 %v2738_v62 }
 0x3bb   :  { %2018 = vmatprep.subr.bf16.mxu0 %v2723_v46  ;;  %2050 = vmatprep.subr.bf16.mxu1 %v2741_v2 }
 0x3be   :  { %2020 = vmatpush1.bf16.msra.mxu0 %v2732_v55  ;;  %2052 = vmatpush1.bf16.msra.mxu1 %v2750_v19 }
 0x3bf   :  { %2022 = vmatprep.subr.bf16.mxu0 %v2735_v59  ;;  %2054 = vmatprep.subr.bf16.mxu1 %v2753_v21 }
 0x3c2   :  { %2024 = vmatpush1.bf16.msra.mxu0 %v2744_v11  ;;  %2056 = vmatpush1.bf16.msra.mxu1 %v2762_v36 }
 0x3c3   :  { %2026 = vmatprep.subr.bf16.mxu0 %v2747_v13  ;;  %2058 = vmatprep.subr.bf16.mxu1 %v2765_v38 }
 0x3c6   :  { %2028 = vmatpush1.bf16.msra.mxu0 %v2756_v31  ;;  %2060 = vmatpush1.bf16.msra.mxu1 %v2772_v49 }
 0x3c7   :  { %2030 = vmatprep.subr.bf16.mxu0 %v2759_v32  ;;  %2062 = vmatprep.subr.bf16.mxu1 %v2775_v51 }
 0x3ca   :  { %2032 = vmatpush1.bf16.msra.mxu0 %v2768_v44  ;;  %2064 = vmatpush1.bf16.msra.mxu1 %v2779_v57 }
 0x3cb   :  { %2066 = vmatprep.subr.bf16.mxu0 %v2687_v4  ;;  %2098 = vmatprep.subr.bf16.mxu1 %v2700_v22 }
 0x480   :  { %v781_v1 = vpop.f32.mrb[6].mxu0  ;;  %v852_v7 = vpop.f32.mrb[6].mxu1 }
 0x481   :  { %v857_v10 = vadd.f32 %v781_v1, %v711_v61  ;;  %v783_v12 = vpop.f32.mrb[7].mxu0  ;;  %v854_v15 = vpop.f32.mrb[7].mxu1  ;;  %v859_v29 = vadd.f32 %v852_v7, %v713_v27  ;;  %v887_v61 = vld [vmem:[#allocation2 + $0xa8] sm:$0xff] }
 0x482   :  { %v858_v16 = vadd.f32 %v783_v12, %v712_v63  ;;  %v860_v24 = vadd.f32 %v854_v15, %v714_v23 }
 0x483   :  { %v1627_v18 = vmul.f32 -1.442695, %v857_v10 }
 0x484   :  { %v1628_v20 = vmul.f32 -1.442695, %v858_v16  ;;  %v1629_v28 = vmul.f32 -1.442695, %v860_v24  ;;  %v888_v24 = vld [vmem:[#allocation2 + $0xb0] sm:$0xff] }
 0x485   :  { %2315 = vpow2.f32 %v1627_v18 }
 0x486   :  { %2317 = vpow2.f32 %v1628_v20  ;;  %v889_v20 = vld [vmem:[#allocation2 + $0xb8] sm:$0xff] }
 0x487   :  { %2319 = vpow2.f32 %v1629_v28 }
 0x488   :  { %2321 = vtanh.f32 %v859_v29 }
 0x48f   :  { %v2316_v34 = vpop.eup %2315 }
 0x490   :  { %v2318_v35 = vpop.eup %2317  ;;  %v864_v39 = vadd.f32 1.0, %v2316_v34 }
 0x491   :  { %v870_v40 = vadd.f32 1.0, %v2318_v35  ;;  %v2320_v41 = vpop.eup %2319 }
 0x492   :  { %2323 = vrcp.f32 %v864_v39  ;;  %v2322_v43 = vpop.eup %2321  ;;  %v877_v54 = vadd.f32 1.0, %v2320_v41 }
 0x493   :  { %2325 = vrcp.f32 %v870_v40 }
 0x494   :  { %2327 = vrcp.f32 %v877_v54 }
 0x49c   :  { %v2324_v47 = vpop.eup %2323 }
 0x49d   :  { %v2326_v50 = vpop.eup %2325  ;;  %v881_v53 = vmul.f32 %v2324_v47, %v2322_v43 }
 0x49e   :  { %v880_v56 = vmul.f32 %v2326_v50, %v2899_v60  ;;  %v2328_v3 = vpop.eup %2327  ;;  %v886_v60 = vld [vmem:[#allocation2 + $0xa0] sm:$0xff] }
 0x4a0   :  { %v2937_v58 = vadd.f32 %v881_v53, %v880_v56 }
 0x4a2   :  { %2329 = vtanh.f32 %v2937_v58 }
 0x4ac   :  { %v2330_v5 = vpop.eup %2329 }
 0x4ad   :  { %v884_v6 = vmul.f32 %v2330_v5, %v2328_v3  ;;  %v1411_v5 = vld [vmem:[#allocation7 + $0x8] sm:$0xff] }
 0x4af   :  { %955 = vmatmul.mubr.f32.vlgmr.msra.gmra.mrb[8].mxu0 %v884_v6  ;;  %1026 = vmatmul.mubr.f32.vlgmr.msra.gmra.mrb[8].mxu1 %v884_v6 }
 0x4b0   :  { %2068 = vmatpush1.bf16.msra.mxu0 %v2689_v8  ;;  %2100 = vmatpush1.bf16.msra.mxu1 %v2702_v25 }
 0x4b1   :  { %2070 = vmatprep.subr.bf16.mxu0 %v2691_v9  ;;  %2102 = vmatprep.subr.bf16.mxu1 %v2712_v33 }
 0x4b2   :  { %1129 = vmatprep.mubr.f32.mxu0 %v2553_v0  ;;  %1200 = vmatprep.mubr.f32.mxu1 %v2553_v0 }
 0x4b4   :  { %2072 = vmatpush1.bf16.msra.mxu0 %v2695_v14  ;;  %2104 = vmatpush1.bf16.msra.mxu1 %v2714_v37 }
 0x4b5   :  { %2074 = vmatprep.subr.bf16.mxu0 %v2698_v17  ;;  %2106 = vmatprep.subr.bf16.mxu1 %v2720_v45 }
 0x4b8   :  { %2076 = vmatpush1.bf16.msra.mxu0 %v2705_v26  ;;  %2108 = vmatpush1.bf16.msra.mxu1 %v2726_v48 }
 0x4b9   :  { %2078 = vmatprep.subr.bf16.mxu0 %v2709_v30  ;;  %2110 = vmatprep.subr.bf16.mxu1 %v2729_v52 }
 0x4bc   :  { %2080 = vmatpush1.bf16.msra.mxu0 %v2718_v42  ;;  %2112 = vmatpush1.bf16.msra.mxu1 %v2738_v62 }
 0x4bd   :  { %2082 = vmatprep.subr.bf16.mxu0 %v2723_v46  ;;  %2114 = vmatprep.subr.bf16.mxu1 %v2741_v2 }
 0x4c0   :  { %2084 = vmatpush1.bf16.msra.mxu0 %v2732_v55  ;;  %2116 = vmatpush1.bf16.msra.mxu1 %v2750_v19 }
 0x4c1   :  { %2086 = vmatprep.subr.bf16.mxu0 %v2735_v59  ;;  %2118 = vmatprep.subr.bf16.mxu1 %v2753_v21 }
 0x4c4   :  { %2088 = vmatpush1.bf16.msra.mxu0 %v2744_v11  ;;  %2120 = vmatpush1.bf16.msra.mxu1 %v2762_v36 }
 0x4c5   :  { %2090 = vmatprep.subr.bf16.mxu0 %v2747_v13  ;;  %2122 = vmatprep.subr.bf16.mxu1 %v2765_v38 }
 0x4c8   :  { %2092 = vmatpush1.bf16.msra.mxu0 %v2756_v31  ;;  %2124 = vmatpush1.bf16.msra.mxu1 %v2772_v49 }
 0x4c9   :  { %2094 = vmatprep.subr.bf16.mxu0 %v2759_v32  ;;  %2126 = vmatprep.subr.bf16.mxu1 %v2775_v51 }
 0x4cc   :  { %2096 = vmatpush1.bf16.msra.mxu0 %v2768_v44  ;;  %2128 = vmatpush1.bf16.msra.mxu1 %v2779_v57 }
 0x4cd   :  { %2130 = vmatprep.subr.bf16.mxu0 %v2687_v4  ;;  %2162 = vmatprep.subr.bf16.mxu1 %v2700_v22 }
 0x582   :  { %v956_v63 = vpop.f32.mrb[8].mxu0  ;;  %v1027_v1 = vpop.f32.mrb[8].mxu1 }
 0x583   :  { %v1032_v7 = vadd.f32 %v956_v63, %v886_v60  ;;  %v958_v10 = vpop.f32.mrb[9].mxu0  ;;  %v1029_v12 = vpop.f32.mrb[9].mxu1  ;;  %v1034_v28 = vadd.f32 %v1027_v1, %v888_v24  ;;  %v2554_v60 = vmov 0.0|0.0   ;;  %v1413_v63 = vld [vmem:[#allocation7 + $0x18] sm:$0xff] }
 0x584   :  { %v1033_v15 = vadd.f32 %v958_v10, %v887_v61  ;;  %v1035_v23 = vadd.f32 %v1029_v12, %v889_v20  ;;  %v1412_v61 = vld [vmem:[#allocation7 + $0x10] sm:$0xff]  ;;  %v1415_v10 = vld [vmem:[#allocation7 + $0x28] sm:$0xff]  ;;  %v1418_v20 = vld [vmem:[#allocation7 + $0x40] sm:$0xff] }
 0x585   :  { %v1630_v16 = vmul.f32 -1.442695, %v1032_v7  ;;  %v2197_v1 = vpack.c.bf16 %v1413_v63, %v1412_v61  ;;  %v1414_v7 = vld [vmem:[#allocation7 + $0x20] sm:$0xff] }
 0x586   :  { %v1631_v18 = vmul.f32 -1.442695, %v1033_v15  ;;  %v1632_v27 = vmul.f32 -1.442695, %v1035_v23  ;;  %v2200_v12 = vpack.c.bf16 %v1415_v10, %v1414_v7  ;;  %v1416_v15 = vld [vmem:[#allocation7 + $0x30] sm:$0xff]  ;;  %v1419_v23 = vld [vmem:[#allocation7 + $0x48] sm:$0xff] }
 0x587   :  { %2331 = vpow2.f32 %v1630_v16  ;;  %v1417_v16 = vld [vmem:[#allocation7 + $0x38] sm:$0xff]  ;;  %v2206_v24 = vpack.c.bf16 %v1419_v23, %v1418_v20 }
 0x588   :  { %2333 = vpow2.f32 %v1631_v18  ;;  %v2203_v18 = vpack.c.bf16 %v1417_v16, %v1416_v15  ;;  %v1518_v20 = vld [vmem:[#allocation10 + $0x70] sm:$0xff]  ;;  %v1519_v23 = vld [vmem:[#allocation10 + $0x78] sm:$0xff] }
 0x589   :  { %2335 = vpow2.f32 %v1632_v27  ;;  %v1420_v27 = vld [vmem:[#allocation7 + $0x50] sm:$0xff] }
 0x58a   :  { %2337 = vtanh.f32 %v1034_v28  ;;  %v1421_v28 = vld [vmem:[#allocation7 + $0x58] sm:$0xff] }
 0x591   :  { %v2332_v4 = vpop.eup %2331 }
 0x592   :  { %v2334_v29 = vpop.eup %2333  ;;  %v1039_v22 = vadd.f32 1.0, %v2332_v4  ;;  %v1422_v4 = vld [vmem:[#allocation7 + $0x60] sm:$0xff] }
 0x593   :  { %v1045_v34 = vadd.f32 1.0, %v2334_v29  ;;  %v2336_v35 = vpop.eup %2335  ;;  %v2209_v29 = vpack.c.bf16 %v1421_v28, %v1420_v27  ;;  %v1639_v27 = vld [vmem:[#allocation8] ss:$0 sm:$0xff] }
 0x594   :  { %2339 = vrcp.f32 %v1039_v22  ;;  %v2338_v39 = vpop.eup %2337  ;;  %v1052_v47 = vadd.f32 1.0, %v2336_v35  ;;  %v1423_v22 = vld [vmem:[#allocation7 + $0x68] sm:$0xff]  ;;  %v1424_v35 = vld [vmem:[#allocation7 + $0x70] sm:$0xff] }
 0x595   :  { %2341 = vrcp.f32 %v1045_v34  ;;  %v2212_v34 = vpack.c.bf16 %v1423_v22, %v1422_v4 }
 0x596   :  { %2343 = vrcp.f32 %v1052_v47  ;;  %v1506_v47 = vld [vmem:[#allocation10 + $0x10] sm:$0xff] }
 0x59e   :  { %v2340_v40 = vpop.eup %2339 }
 0x59f   :  { %v2342_v41 = vpop.eup %2341  ;;  %v1056_v43 = vmul.f32 %v2340_v40, %v2338_v39  ;;  %v1425_v39 = vld [vmem:[#allocation7 + $0x78] sm:$0xff] }
 0x5a0   :  { %v1055_v50 = vmul.f32 %v2342_v41, %v2937_v58  ;;  %v2344_v54 = vpop.eup %2343  ;;  %v1410_v58 = vld [vmem:[#allocation7] sm:$0xff]  ;;  %v2215_v40 = vpack.c.bf16 %v1425_v39, %v1424_v35 }
 0x5a1   :  { %v2194_v6 = vpack.c.bf16 %v1411_v5, %v1410_v58  ;;  %v1504_v41 = vld [vmem:[#allocation10] sm:$0xff] }
 0x5a2   :  { %v2975_v53 = vadd.f32 %v1056_v43, %v1055_v50  ;;  %v1505_v43 = vld [vmem:[#allocation10 + $0x8] sm:$0xff] }
 0x5a3   :  { %v2218_v50 = vpack.c.bf16 %v1505_v43, %v1504_v41 }
 0x5a4   :  { %2345 = vtanh.f32 %v2975_v53 }
 0x5ae   :  { %v2346_v56 = vpop.eup %2345 }
 0x5af   :  { %v1059_v3 = vmul.f32 %v2346_v56, %v2344_v54  ;;  %v1509_v56 = vld [vmem:[#allocation10 + $0x28] sm:$0xff] }
 0x5b1   :  { %1130 = vmatmul.mubr.f32.vlgmr.msra.gmra.mrb[10].mxu0 %v1059_v3  ;;  %1201 = vmatmul.mubr.f32.vlgmr.msra.gmra.mrb[10].mxu1 %v1059_v3 }
 0x5b2   :  { %2132 = vmatpush1.bf16.msra.mxu0 %v2689_v8  ;;  %2164 = vmatpush1.bf16.msra.mxu1 %v2702_v25  ;;  %v1061_v8 = vld [vmem:[#allocation2 + $0xc0] sm:$0xff] }
 0x5b3   :  { %2134 = vmatprep.subr.bf16.mxu0 %v2691_v9  ;;  %2166 = vmatprep.subr.bf16.mxu1 %v2712_v33  ;;  %v1062_v9 = vld [vmem:[#allocation2 + $0xc8] sm:$0xff] }
 0x5b4   :  { %1304 = vmatprep.mubr.f32.mxu0 %v2553_v0  ;;  %1375 = vmatprep.mubr.f32.mxu1 %v2553_v0 }
 0x5b6   :  { %2136 = vmatpush1.bf16.msra.mxu0 %v2695_v14  ;;  %2168 = vmatpush1.bf16.msra.mxu1 %v2714_v37 }
 0x5b7   :  { %2138 = vmatprep.subr.bf16.mxu0 %v2698_v17  ;;  %2170 = vmatprep.subr.bf16.mxu1 %v2720_v45  ;;  %v1064_v45 = vld [vmem:[#allocation2 + $0xd8] sm:$0xff] }
 0x5ba   :  { %2140 = vmatpush1.bf16.msra.mxu0 %v2705_v26  ;;  %2172 = vmatpush1.bf16.msra.mxu1 %v2726_v48  ;;  %v1063_v48 = vld [vmem:[#allocation2 + $0xd0] sm:$0xff] }
 0x5bb   :  { %2142 = vmatprep.subr.bf16.mxu0 %v2709_v30  ;;  %2174 = vmatprep.subr.bf16.mxu1 %v2729_v52 }
 0x5be   :  { %2144 = vmatpush1.bf16.msra.mxu0 %v2718_v42  ;;  %2176 = vmatpush1.bf16.msra.mxu1 %v2738_v62 }
 0x5bf   :  { %2146 = vmatprep.subr.bf16.mxu0 %v2723_v46  ;;  %2178 = vmatprep.subr.bf16.mxu1 %v2741_v2 }
 0x5c2   :  { %2148 = vmatpush1.bf16.msra.mxu0 %v2732_v55  ;;  %2180 = vmatpush1.bf16.msra.mxu1 %v2750_v19 }
 0x5c3   :  { %2150 = vmatprep.subr.bf16.mxu0 %v2735_v59  ;;  %2182 = vmatprep.subr.bf16.mxu1 %v2753_v21 }
 0x5c6   :  { %2152 = vmatpush1.bf16.msra.mxu0 %v2744_v11  ;;  %2184 = vmatpush1.bf16.msra.mxu1 %v2762_v36 }
 0x5c7   :  { %2154 = vmatprep.subr.bf16.mxu0 %v2747_v13  ;;  %2186 = vmatprep.subr.bf16.mxu1 %v2765_v38 }
 0x5ca   :  { %2156 = vmatpush1.bf16.msra.mxu0 %v2756_v31  ;;  %2188 = vmatpush1.bf16.msra.mxu1 %v2772_v49 }
 0x5cb   :  { %2158 = vmatprep.subr.bf16.mxu0 %v2759_v32  ;;  %2190 = vmatprep.subr.bf16.mxu1 %v2775_v51 }
 0x5ce   :  { %2160 = vmatpush1.bf16.msra.mxu0 %v2768_v44  ;;  %2192 = vmatpush1.bf16.msra.mxu1 %v2779_v57 }
 0x5cf   :  { %2193 = vmatprep.subr.bf16.mxu0 %v2554_v60  ;;  %2217 = vmatprep.subr.bf16.mxu1 %v2554_v60 }
 0x684   :  { %v1131_v14 = vpop.f32.mrb[10].mxu0  ;;  %v1202_v17 = vpop.f32.mrb[10].mxu1 }
 0x685   :  { %v1207_v25 = vadd.f32 %v1131_v14, %v1061_v8  ;;  %v1133_v26 = vpop.f32.mrb[11].mxu0  ;;  %v1204_v30 = vpop.f32.mrb[11].mxu1  ;;  %v1209_v55 = vadd.f32 %v1202_v17, %v1063_v48  ;;  %v1510_v8 = vld [vmem:[#allocation10 + $0x30] sm:$0xff]  ;;  %v1512_v17 = vld [vmem:[#allocation10 + $0x40] sm:$0xff] }
 0x686   :  { %v1208_v33 = vadd.f32 %v1133_v26, %v1062_v9  ;;  %v1210_v46 = vadd.f32 %v1204_v30, %v1064_v45  ;;  %v1511_v9 = vld [vmem:[#allocation10 + $0x38] sm:$0xff]  ;;  %v1514_v30 = vld [vmem:[#allocation10 + $0x50] sm:$0xff]  ;;  %v1517_v45 = vld [vmem:[#allocation10 + $0x68] sm:$0xff] }
 0x687   :  { %v1633_v37 = vmul.f32 -1.442695, %v1207_v25  ;;  %v2227_v14 = vpack.c.bf16 %v1511_v9, %v1510_v8  ;;  %v1513_v25 = vld [vmem:[#allocation10 + $0x48] sm:$0xff]  ;;  %v1236_v48 = vld [vmem:[#allocation2 + $0xe0] sm:$0xff] }
 0x688   :  { %v1634_v42 = vmul.f32 -1.442695, %v1208_v33  ;;  %v1635_v52 = vmul.f32 -1.442695, %v1210_v46  ;;  %v2230_v26 = vpack.c.bf16 %v1513_v25, %v1512_v17  ;;  %v1515_v33 = vld [vmem:[#allocation10 + $0x58] sm:$0xff] }
 0x689   :  { %2347 = vpow2.f32 %v1633_v37  ;;  %v2233_v37 = vpack.c.bf16 %v1515_v33, %v1514_v30 }
 0x68a   :  { %2349 = vpow2.f32 %v1634_v42  ;;  %v1516_v42 = vld [vmem:[#allocation10 + $0x60] sm:$0xff] }
 0x68b   :  { %2351 = vpow2.f32 %v1635_v52  ;;  %v2236_v46 = vpack.c.bf16 %v1517_v45, %v1516_v42  ;;  %v1237_v52 = vld [vmem:[#allocation2 + $0xe8] sm:$0xff] }
 0x68c   :  { %2353 = vtanh.f32 %v1209_v55 }
 0x693   :  { %v2348_v59 = vpop.eup %2347 }
 0x694   :  { %v2350_v62 = vpop.eup %2349  ;;  %v1214_v2 = vadd.f32 1.0, %v2348_v59 }
 0x695   :  { %v1220_v11 = vadd.f32 1.0, %v2350_v62  ;;  %v2352_v13 = vpop.eup %2351 }
 0x696   :  { %2355 = vrcp.f32 %v1214_v2  ;;  %v2354_v19 = vpop.eup %2353  ;;  %v1227_v36 = vadd.f32 1.0, %v2352_v13 }
 0x697   :  { %2357 = vrcp.f32 %v1220_v11 }
 0x698   :  { %2359 = vrcp.f32 %v1227_v36  ;;  %v1238_v36 = vld [vmem:[#allocation2 + $0xf0] sm:$0xff] }
 0x6a0   :  { %v2356_v21 = vpop.eup %2355 }
 0x6a1   :  { %v2358_v31 = vpop.eup %2357  ;;  %v1231_v32 = vmul.f32 %v2356_v21, %v2354_v19 }
 0x6a2   :  { %v1230_v38 = vmul.f32 %v2358_v31, %v2975_v53  ;;  %v2360_v49 = vpop.eup %2359  ;;  %v1507_v53 = vld [vmem:[#allocation10 + $0x18] sm:$0xff] }
 0x6a3   :  { %v2221_v54 = vpack.c.bf16 %v1507_v53, %v1506_v47  ;;  %v1239_v31 = vld [vmem:[#allocation2 + $0xf8] sm:$0xff] }
 0x6a4   :  { %v3011_v44 = vadd.f32 %v1231_v32, %v1230_v38 }
 0x6a6   :  { %2361 = vtanh.f32 %v3011_v44 }
 0x6b0   :  { %v2362_v51 = vpop.eup %2361 }
 0x6b1   :  { %v1234_v57 = vmul.f32 %v2362_v51, %v2360_v49 }
 0x6b3   :  { %1305 = vmatmul.mubr.f32.vlgmr.msra.gmra.mrb[12].mxu0 %v1234_v57  ;;  %1376 = vmatmul.mubr.f32.vlgmr.msra.gmra.mrb[12].mxu1 %v1234_v57 }
 0x6b4   :  { %2195 = vmatpush3.bf16.msra.mxu0 %v2194_v6  ;;  %1707 = vmatprep.mubr.msk.f32.mxu0 %vm2555_vm0, %v2553_v0 }
 0x6b5   :  { %2196 = vmatprep.subr.bf16.mxu0 %v2554_v60  ;;  %1742 = vmatprep.mubr.msk.f32.mxu1 %vm2555_vm0, %v2553_v0  ;;  %v1508_v0 = vld [vmem:[#allocation10 + $0x20] sm:$0xff] }
 0x6b6   :  { %2219 = vmatpush3.bf16.msra.mxu1 %v2218_v50  ;;  %v2224_v3 = vpack.c.bf16 %v1509_v56, %v1508_v0 }
 0x6b7   :  { %2220 = vmatprep.subr.bf16.mxu1 %v2554_v60 }
 0x6b8   :  { %2198 = vmatpush3.bf16.msra.mxu0 %v2197_v1 }
 0x6b9   :  { %2199 = vmatprep.subr.bf16.mxu0 %v2554_v60 }
 0x6ba   :  { %2222 = vmatpush3.bf16.msra.mxu1 %v2221_v54 }
 0x6bb   :  { %2223 = vmatprep.subr.bf16.mxu1 %v2554_v60 }
 0x6bc   :  { %2201 = vmatpush3.bf16.msra.mxu0 %v2200_v12 }
 0x6bd   :  { %2202 = vmatprep.subr.bf16.mxu0 %v2554_v60 }
 0x6be   :  { %2225 = vmatpush3.bf16.msra.mxu1 %v2224_v3 }
 0x6bf   :  { %2226 = vmatprep.subr.bf16.mxu1 %v2554_v60 }
 0x6c0   :  { %2204 = vmatpush3.bf16.msra.mxu0 %v2203_v18 }
 0x6c1   :  { %2205 = vmatprep.subr.bf16.mxu0 %v2554_v60 }
 0x6c2   :  { %2228 = vmatpush3.bf16.msra.mxu1 %v2227_v14 }
 0x6c3   :  { %2229 = vmatprep.subr.bf16.mxu1 %v2554_v60 }
 0x6c4   :  { %2207 = vmatpush3.bf16.msra.mxu0 %v2206_v24  ;;  %v2239_v24 = vpack.c.bf16 %v1519_v23, %v1518_v20 }
 0x6c5   :  { %2208 = vmatprep.subr.bf16.mxu0 %v2554_v60 }
 0x6c6   :  { %2231 = vmatpush3.bf16.msra.mxu1 %v2230_v26 }
 0x6c7   :  { %2232 = vmatprep.subr.bf16.mxu1 %v2554_v60 }
 0x6c8   :  { %2210 = vmatpush3.bf16.msra.mxu0 %v2209_v29 }
 0x6c9   :  { %2211 = vmatprep.subr.bf16.mxu0 %v2554_v60 }
 0x6ca   :  { %2234 = vmatpush3.bf16.msra.mxu1 %v2233_v37 }
 0x6cb   :  { %2235 = vmatprep.subr.bf16.mxu1 %v2554_v60 }
 0x6cc   :  { %2213 = vmatpush3.bf16.msra.mxu0 %v2212_v34  ;;  %v1640_v34 = vld [vmem:[#allocation11] ss:$0 sm:$0xff] }
 0x6cd   :  { %2214 = vmatprep.subr.bf16.mxu0 %v2554_v60 }
 0x6ce   :  { %2237 = vmatpush3.bf16.msra.mxu1 %v2236_v46 }
 0x6cf   :  { %2238 = vmatprep.subr.bf16.mxu1 %v2554_v60 }
 0x6d0   :  { %2216 = vmatpush3.bf16.msra.mxu0 %v2215_v40 }
 0x6d2   :  { %2240 = vmatpush3.bf16.msra.mxu1 %v2239_v24 }
 0x786   :  { %v1306_v55 = vpop.f32.mrb[12].mxu0  ;;  %v1377_v59 = vpop.f32.mrb[12].mxu1 }
 0x787   :  { %v1382_v62 = vadd.f32 %v1306_v55, %v1236_v48  ;;  %v1308_v2 = vpop.f32.mrb[13].mxu0  ;;  %v1379_v11 = vpop.f32.mrb[13].mxu1  ;;  %v1384_v49 = vadd.f32 %v1377_v59, %v1238_v36 }
 0x788   :  { %v1383_v13 = vadd.f32 %v1308_v2, %v1237_v52  ;;  %v1385_v32 = vadd.f32 %v1379_v11, %v1239_v31 }
 0x789   :  { %v1636_v19 = vmul.f32 -1.442695, %v1382_v62 }
 0x78a   :  { %v1637_v21 = vmul.f32 -1.442695, %v1383_v13  ;;  %v1638_v38 = vmul.f32 -1.442695, %v1385_v32 }
 0x78b   :  { %2363 = vpow2.f32 %v1636_v19 }
 0x78c   :  { %2365 = vpow2.f32 %v1637_v21 }
 0x78d   :  { %2367 = vpow2.f32 %v1638_v38 }
 0x78e   :  { %2369 = vtanh.f32 %v1384_v49 }
 0x795   :  { %v2364_v51 = vpop.eup %2363 }
 0x796   :  { %v2366_v57 = vpop.eup %2365  ;;  %v1389_v58 = vadd.f32 1.0, %v2364_v51 }
 0x797   :  { %v1395_v5 = vadd.f32 1.0, %v2366_v57  ;;  %v2368_v6 = vpop.eup %2367 }
 0x798   :  { %2371 = vrcp.f32 %v1389_v58  ;;  %v2370_v60 = vpop.eup %2369  ;;  %v1402_v7 = vadd.f32 1.0, %v2368_v6 }
 0x799   :  { %2373 = vrcp.f32 %v1395_v5 }
 0x79a   :  { %2375 = vrcp.f32 %v1402_v7 }
 0x7a2   :  { %v2372_v61 = vpop.eup %2371 }
 0x7a3   :  { %v2374_v63 = vpop.eup %2373  ;;  %v1406_v1 = vmul.f32 %v2372_v61, %v2370_v60 }
 0x7a4   :  { %v1405_v10 = vmul.f32 %v2374_v63, %v3011_v44  ;;  %v2376_v15 = vpop.eup %2375 }
 0x7a6   :  { %v1407_v12 = vadd.f32 %v1406_v1, %v1405_v10 }
 0x7a8   :  { %2377 = vtanh.f32 %v1407_v12 }
 0x7b2   :  { %v2378_v16 = vpop.eup %2377 }
 0x7b3   :  { %v1409_v18 = vmul.f32 %v2378_v16, %v2376_v15 }
 0x7b5   :  { %1708 = vmatmul.mubr.f32.vlgmr.msra.gmra.mrb[14].mxu0 %v1409_v18 }
 0x888   :  { %v1499_v28 = vpop.f32.mrb[14].mxu0 }
 0x889   :  { %v1500_v4 = vadd.f32 %v1639_v27, %v1499_v28  ;;  %v1709_v29 = vpop.f32.mrb[15].mxu0 }
 0x88b   :  { %v1503_v22 = vmax.f32 %v1500_v4, 0.0 }
 0x88d   :  { %1743 = vmatmul.mubr.f32.vlgmr.msra.gmra.mrb[14].mxu1 %v1503_v22 }
 0x960   :  { %v1593_v44 = vpop.f32.mrb[14].mxu1 }
 0x961   :  { %v1594_v35 = vadd.f32 %v1640_v34, %v1593_v44  ;;  %v1744_v39 = vpop.f32.mrb[15].mxu1 }
 0x963   :  { %1597 = vst [vmem:[#allocation13] sm:$0xff] %v1594_v35 }
 0x964   :  { %2522 = shalt.err (!%p2519_p10)
}
 0x965   :  { %s2523_s22 = scalar_lea.hbm %s3051_s6, 128 }
 0x966   :  { %p2524_p11 = scmp.ne.s32.totalorder %s3051_s6, %s2523_s22  ;;  %p2527_p12 = scmp.lt.u32.totalorder %s2523_s22, %s3051_s6 }
 0x968   :  { %p2529_p13 = pnand %p2527_p12, %p2524_p11 }
 0x96a   :  { %2532 = shalt.err (!%p2529_p13)
}
 0x96b   :  { %1607 = dma.vmem_to_hbm [thread:$0]  %s1605_s0, 128, %s3051_s6, [#allocation4]  }
 0x96c   :  { %2541 = dma.done.wait [#allocation4], 128  }
 0x96d   :  { %2542 = vsyncadd [#allocation4], 4294967168 }
 0x96e   :  { %1611 = vsyncpa [#allocation3], 1 }
 0x96f   :  { %1612 = vsyncpa [#allocation6], 1 }
 0x970   :  { %1613 = vsyncpa [#allocation9], 1 }
 0x971   :  { %1614 = vsyncpa [#allocation12], 1 }
 0x972   :  { %1615 = vsyncpa [#allocation4], 1 }

</bundles_post_ra>
